<compile_context>
chip_gen: v6e
topology: v6e:2x2x1
jax: 0.10.0
libtpu: 0.0.40
codegen_flags: <defaults>
</compile_context>

<pallas_src>
import numpy as np
import jax
import jax.numpy as jnp
from jax import lax
from jax.experimental import pallas as pl
from jax.experimental.pallas import tpu as pltpu

# ----- small, module-consistent shapes -----
B = 2            # batch
S = 8            # sequence length
D_IN = 16        # input_dim
DP = 128         # input_dim zero-padded to a full lane width
D = 128          # hidden_dim
H = 4            # num_heads
HD = D // H      # head dim
L = 4            # num_layers
FF = 4 * D       # dim_feedforward = hidden_dim * 4
EPS = 1e-5       # LayerNorm eps (PyTorch default)
N_CLS = 2
N = B * S        # total activation rows
NEG = -1e30      # cross-batch attention mask value


def _layernorm(v, w, b):
    mu = jnp.mean(v, axis=-1, keepdims=True)
    var = jnp.mean((v - mu) ** 2, axis=-1, keepdims=True)
    return (v - mu) * lax.rsqrt(var + EPS) * w + b


def transformer_kernel(x_ref, pe_ref, mask_ref,
                       emb_w_ref, emb_b_ref,
                       wqkv_ref, bqkv_ref, wo_ref, bo_ref,
                       ln1_w_ref, ln1_b_ref, ln2_w_ref, ln2_b_ref,
                       ff1_w_ref, ff1_b_ref, ff2_w_ref, ff2_b_ref,
                       attn_w_ref, attn_b_ref,
                       c1_w_ref, c1_b_ref, c2_w_ref, c2_b_ref,
                       o_ref, h_ref):
    f32 = jnp.float32
    bf16 = jnp.bfloat16
    scale = 1.0 / float(np.sqrt(HD))
    l = pl.program_id(0)

    # --- embedding + sinusoidal positional encoding (first grid step only) ---
    @pl.when(l == 0)
    def _():
        x = x_ref[...].astype(bf16)                                       # (N, DP)
        h0 = jnp.dot(x, emb_w_ref[...], preferred_element_type=f32) + emb_b_ref[...]
        h_ref[...] = h0 + pe_ref[...]                                     # (N, D)

    # --- one encoder layer per grid step (post-LN, ReLU FFN, dropout=identity) ---
    h = h_ref[...]                                                        # (N, D) f32
    hb = h.astype(bf16)

    # fused QKV projection: single lane-dense K=128 GEMM
    qkv = jnp.dot(hb, wqkv_ref[...], preferred_element_type=f32) + bqkv_ref[...]   # (N, 3D)
    q = qkv[:, 0:D]
    k = qkv[:, D:2 * D]
    v = qkv[:, 2 * D:3 * D]

    def split_heads(t):                                                   # (N, D) -> (H, N, HD)
        return jnp.concatenate(
            [t[None, :, hh * HD:(hh + 1) * HD] for hh in range(H)], axis=0)

    qh = split_heads(q)
    kh = split_heads(k)
    vh = split_heads(v)

    # head-batched attention over full (N, N) with block-diagonal batch mask
    s = lax.dot_general(qh, kh, (((2,), (2,)), ((0,), (0,))),
                        preferred_element_type=f32) * scale               # (H, N, N)
    s = s + mask_ref[...]                                                 # mask cross-batch
    s = s - jnp.max(s, axis=-1, keepdims=True)
    p = jnp.exp(s)
    p = p * pl.reciprocal(jnp.sum(p, axis=-1, keepdims=True), approx=True)
    o = lax.dot_general(p, vh, (((2,), (1,)), ((0,), (0,))),
                        preferred_element_type=f32)                       # (H, N, HD)
    o2d = jnp.concatenate([o[hh] for hh in range(H)], axis=1)             # (N, D) head-major

    # fused output projection: one K=128 GEMM
    attn = jnp.dot(o2d.astype(bf16), wo_ref[...],
                   preferred_element_type=f32) + bo_ref[...]              # (N, D)
    h = _layernorm(h + attn, ln1_w_ref[...], ln1_b_ref[...])

    ff = jnp.dot(h.astype(bf16), ff1_w_ref[...],
                 preferred_element_type=f32) + ff1_b_ref[...]             # (N, FF)
    ff = jnp.maximum(ff, 0.0)
    ff = jnp.dot(ff.astype(bf16), ff2_w_ref[...],
                 preferred_element_type=f32) + ff2_b_ref[...]             # (N, D)
    h = _layernorm(h + ff, ln2_w_ref[...], ln2_b_ref[...])
    h_ref[...] = h

    # --- attention pooling over sequence + classification head (last step only) ---
    @pl.when(l == L - 1)
    def _():
        h3 = h.reshape(B, S, D)
        logits = jnp.sum(h3 * attn_w_ref[...], axis=-1, keepdims=True) + attn_b_ref[...]  # (B,S,1)
        logits = logits - jnp.max(logits, axis=1, keepdims=True)
        e = jnp.exp(logits)
        w = e * pl.reciprocal(jnp.sum(e, axis=1, keepdims=True), approx=True)
        pooled = jnp.sum(h3 * w, axis=1)                                  # (B, D)

        c = jnp.dot(pooled.astype(jnp.bfloat16), c1_w_ref[...],
                    preferred_element_type=jnp.float32) + c1_b_ref[...]
        c = jnp.maximum(c, 0.0)
        out = lax.dot_general(c, c2_w_ref[...], (((1,), (1,)), ((), ())),
                              preferred_element_type=jnp.float32) + c2_b_ref[...]
        o_ref[...] = out


def forward(x, params):
    (pe, emb_w, emb_b, wqkv, bqkv, wo, bo,
     ln1_w, ln1_b, ln2_w, ln2_b,
     ff1_w, ff1_b, ff2_w, ff2_b,
     attn_w, attn_b, c1_w, c1_b, c2_w, c2_b) = params

    # Pad features to a full 128-lane width (exact: padded weight rows are 0) and
    # flatten batch/seq so the kernel sees lane-dense (N, 128) slabs.
    xp = jnp.pad(x, ((0, 0), (0, 0), (0, DP - D_IN))).reshape(N, DP)
    pe_flat = jnp.tile(pe, (B, 1))                                        # (N, D)

    # block-diagonal (same-batch) attention mask
    row = np.arange(N)[:, None] // S
    col = np.arange(N)[None, :] // S
    mask = jnp.asarray(np.where(row == col, 0.0, NEG).astype(np.float32))  # (N, N)

    def const2d(a):
        return pl.BlockSpec(a.shape, lambda l: (0, 0))

    def per_layer(a):
        return pl.BlockSpec((None,) + a.shape[1:], lambda l: (l, 0, 0))

    inputs = (xp, pe_flat, mask, emb_w, emb_b,
              wqkv, bqkv, wo, bo,
              ln1_w, ln1_b, ln2_w, ln2_b,
              ff1_w, ff1_b, ff2_w, ff2_b,
              attn_w, attn_b, c1_w, c1_b, c2_w, c2_b)

    in_specs = [const2d(xp), const2d(pe_flat), const2d(mask),
                const2d(emb_w), const2d(emb_b),
                per_layer(wqkv), per_layer(bqkv), per_layer(wo), per_layer(bo),
                per_layer(ln1_w), per_layer(ln1_b), per_layer(ln2_w), per_layer(ln2_b),
                per_layer(ff1_w), per_layer(ff1_b), per_layer(ff2_w), per_layer(ff2_b),
                const2d(attn_w), const2d(attn_b),
                const2d(c1_w), const2d(c1_b), const2d(c2_w), const2d(c2_b)]

    flops = (2 * N * DP * D
             + L * (2 * N * D * (3 * D)          # fused QKV
                    + 2 * 2 * H * N * N * HD     # scores + PV
                    + 2 * N * D * D              # out proj
                    + 2 * N * D * FF + 2 * N * FF * D)  # FFN
             + 2 * B * D * D + 2 * B * D * N_CLS)
    transcendentals = L * H * N * N + B * S
    bytes_accessed = sum(int(np.prod(a.shape)) * a.dtype.itemsize for a in inputs) + B * N_CLS * 4

    return pl.pallas_call(
        transformer_kernel,
        out_shape=jax.ShapeDtypeStruct((B, N_CLS), jnp.float32),
        grid_spec=pltpu.PrefetchScalarGridSpec(
            num_scalar_prefetch=0,
            grid=(L,),
            in_specs=in_specs,
            out_specs=pl.BlockSpec((B, N_CLS), lambda l: (0, 0)),
            scratch_shapes=[pltpu.VMEM((N, D), jnp.float32)]),
        compiler_params=pltpu.CompilerParams(
            dimension_semantics=("arbitrary",)),
        cost_estimate=pl.CostEstimate(flops=int(flops),
                                      transcendentals=int(transcendentals),
                                      bytes_accessed=int(bytes_accessed)),
    )(*inputs)


def make_positional_encoding(seq_len, d_model):
    pe = np.zeros((seq_len, d_model), dtype=np.float32)
    position = np.arange(0, seq_len, dtype=np.float32)[:, None]
    div_term = np.exp(np.arange(0, d_model, 2, dtype=np.float32) * (-np.log(10000.0) / d_model))
    pe[:, 0::2] = np.sin(position * div_term)
    pe[:, 1::2] = np.cos(position * div_term)
    return jnp.asarray(pe)


def make_params(key):
    ks = jax.random.split(key, 16)

    def init(k, shape, scale=0.05):
        return (scale * jax.random.normal(k, shape)).astype(jnp.float32)

    def bf16(a):
        return a.astype(jnp.bfloat16)

    pe = make_positional_encoding(S, D)                                   # (S, D)

    emb_w = bf16(jnp.pad(init(ks[0], (D_IN, D)), ((0, DP - D_IN), (0, 0))))  # (DP, D)
    emb_b = init(ks[1], (1, D))

    # fused in-projection: columns [0:D]=Q, [D:2D]=K, [2D:3D]=V; heads split contiguously
    wqkv = bf16(init(ks[2], (L, D, 3 * D)))
    bqkv = init(ks[3], (L, 1, 3 * D))
    # out-projection applied to head-major concatenated attention output
    wo = bf16(init(ks[4], (L, D, D)))
    bo = init(ks[5], (L, 1, D))

    ln1_w = jnp.ones((L, 1, D), jnp.float32); ln1_b = jnp.zeros((L, 1, D), jnp.float32)
    ln2_w = jnp.ones((L, 1, D), jnp.float32); ln2_b = jnp.zeros((L, 1, D), jnp.float32)

    ff1_w = bf16(init(ks[6], (L, D, FF))); ff1_b = init(ks[7], (L, 1, FF))
    ff2_w = bf16(init(ks[8], (L, FF, D))); ff2_b = init(ks[9], (L, 1, D))

    attn_w = init(ks[10], (1, D)); attn_b = init(ks[11], (1, 1))
    c1_w = bf16(init(ks[12], (D, D))); c1_b = init(ks[13], (1, D))
    c2_w = init(ks[14], (N_CLS, D));   c2_b = init(ks[15], (1, N_CLS))

    return (pe, emb_w, emb_b, wqkv, bqkv, wo, bo,
            ln1_w, ln1_b, ln2_w, ln2_b,
            ff1_w, ff1_b, ff2_w, ff2_b,
            attn_w, attn_b, c1_w, c1_b, c2_w, c2_b)


def reference_forward(x, params):
    """Pure-JAX reference mirroring the kernel's bf16-operand / f32-accumulate GEMMs."""
    (pe, emb_w, emb_b, wqkv, bqkv, wo, bo,
     ln1_w, ln1_b, ln2_w, ln2_b,
     ff1_w, ff1_b, ff2_w, ff2_b,
     attn_w, attn_b, c1_w, c1_b, c2_w, c2_b) = params
    f32 = jnp.float32
    bf16 = jnp.bfloat16

    def mm(a, w):  # bf16 x bf16 operands, f32 accumulation (mirrors the MXU path)
        a = a.astype(bf16)
        return lax.dot_general(a, w, (((a.ndim - 1,), (0,)), ((), ())),
                               preferred_element_type=f32)

    xp = jnp.pad(x, ((0, 0), (0, 0), (0, DP - D_IN)))                     # (B, S, DP)
    h = mm(xp, emb_w) + emb_b + pe[None]                                  # (B, S, D)
    scale = 1.0 / np.sqrt(HD)
    for l in range(L):
        qkv = mm(h, wqkv[l]) + bqkv[l]                                    # (B, S, 3D)
        q, k, v = qkv[..., :D], qkv[..., D:2 * D], qkv[..., 2 * D:]
        qh = q.reshape(B, S, H, HD).transpose(0, 2, 1, 3)                 # (B, H, S, HD)
        kh = k.reshape(B, S, H, HD).transpose(0, 2, 1, 3)
        vh = v.reshape(B, S, H, HD).transpose(0, 2, 1, 3)
        s = jnp.einsum('bhqe,bhke->bhqk', qh, kh) * scale
        p = jax.nn.softmax(s, axis=-1)
        o = jnp.einsum('bhqk,bhke->bhqe', p, vh)
        o = o.transpose(0, 2, 1, 3).reshape(B, S, D)                      # head-major concat
        attn = mm(o, wo[l]) + bo[l]
        h = _layernorm(h + attn, ln1_w[l], ln1_b[l])
        ff = jnp.maximum(mm(h, ff1_w[l]) + ff1_b[l], 0.0)
        ff = mm(ff, ff2_w[l]) + ff2_b[l]
        h = _layernorm(h + ff, ln2_w[l], ln2_b[l])
    logits = jnp.einsum('bsd,d->bs', h, attn_w[0]) + attn_b[0, 0]
    w = jax.nn.softmax(logits, axis=1)[..., None]                         # softmax over seq
    pooled = jnp.sum(h * w, axis=1)                                       # (B, D)
    c = jnp.maximum(mm(pooled, c1_w) + c1_b, 0.0)
    return jnp.dot(c, c2_w.T) + c2_b


if __name__ == "__main__":
    key = jax.random.PRNGKey(0)
    kx, kp = jax.random.split(key)
    x = jax.random.normal(kx, (B, S, D_IN), dtype=jnp.float32)
    params = make_params(kp)

    out = jax.block_until_ready(forward(x, params))

    with jax.default_matmul_precision("float32"):
        ref = jax.block_until_ready(reference_forward(x, params))

    np.testing.assert_allclose(np.asarray(out), np.asarray(ref), rtol=1e-2, atol=1e-2)
    print("KERNEL_OK")
</pallas_src>

<mosaic_0001>
module attributes {stable_mosaic.version = 11 : i64} {
  func.func @transformer_kernel(%arg0: i32, %arg1: memref<16x128xf32, #tpu.memory_space<vmem>>, %arg2: memref<16x128xf32, #tpu.memory_space<vmem>>, %arg3: memref<16x16xf32, #tpu.memory_space<vmem>>, %arg4: memref<128x128xbf16, #tpu.memory_space<vmem>>, %arg5: memref<1x128xf32, #tpu.memory_space<vmem>>, %arg6: memref<1x128x384xbf16, #tpu.memory_space<vmem>>, %arg7: memref<1x1x384xf32, #tpu.memory_space<vmem>>, %arg8: memref<1x128x128xbf16, #tpu.memory_space<vmem>>, %arg9: memref<1x1x128xf32, #tpu.memory_space<vmem>>, %arg10: memref<1x1x128xf32, #tpu.memory_space<vmem>>, %arg11: memref<1x1x128xf32, #tpu.memory_space<vmem>>, %arg12: memref<1x1x128xf32, #tpu.memory_space<vmem>>, %arg13: memref<1x1x128xf32, #tpu.memory_space<vmem>>, %arg14: memref<1x128x512xbf16, #tpu.memory_space<vmem>>, %arg15: memref<1x1x512xf32, #tpu.memory_space<vmem>>, %arg16: memref<1x512x128xbf16, #tpu.memory_space<vmem>>, %arg17: memref<1x1x128xf32, #tpu.memory_space<vmem>>, %arg18: memref<1x128xf32, #tpu.memory_space<vmem>>, %arg19: memref<1x1xf32, #tpu.memory_space<vmem>>, %arg20: memref<128x128xbf16, #tpu.memory_space<vmem>>, %arg21: memref<1x128xf32, #tpu.memory_space<vmem>>, %arg22: memref<2x128xf32, #tpu.memory_space<vmem>>, %arg23: memref<1x2xf32, #tpu.memory_space<vmem>>, %arg24: memref<2x2xf32, #tpu.memory_space<vmem>>, %arg25: memref<16x128xf32, #tpu.memory_space<vmem>>) attributes {dimension_semantics = [#tpu.dimension_semantics<arbitrary>], iteration_bounds = array<i64: 4>, scalar_prefetch = 0 : i64, scratch_operands = 1 : i64, tpu.core_type = #tpu.core_type<tc>, window_params = [{pipeline_mode = #tpu.pipeline_mode<synchronous>, transform_indices = @transform_0, window_bounds = array<i64: 16, 128>}, {pipeline_mode = #tpu.pipeline_mode<synchronous>, transform_indices = @transform_1, window_bounds = array<i64: 16, 128>}, {pipeline_mode = #tpu.pipeline_mode<synchronous>, transform_indices = @transform_2, window_bounds = array<i64: 16, 16>}, {pipeline_mode = #tpu.pipeline_mode<synchronous>, transform_indices = @transform_3, window_bounds = array<i64: 128, 128>}, {pipeline_mode = #tpu.pipeline_mode<synchronous>, transform_indices = @transform_4, window_bounds = array<i64: 1, 128>}, {transform_indices = @transform_5, window_bounds = array<i64: 1, 128, 384>}, {transform_indices = @transform_6, window_bounds = array<i64: 1, 1, 384>}, {transform_indices = @transform_7, window_bounds = array<i64: 1, 128, 128>}, {transform_indices = @transform_8, window_bounds = array<i64: 1, 1, 128>}, {transform_indices = @transform_9, window_bounds = array<i64: 1, 1, 128>}, {transform_indices = @transform_10, window_bounds = array<i64: 1, 1, 128>}, {transform_indices = @transform_11, window_bounds = array<i64: 1, 1, 128>}, {transform_indices = @transform_12, window_bounds = array<i64: 1, 1, 128>}, {transform_indices = @transform_13, window_bounds = array<i64: 1, 128, 512>}, {transform_indices = @transform_14, window_bounds = array<i64: 1, 1, 512>}, {transform_indices = @transform_15, window_bounds = array<i64: 1, 512, 128>}, {transform_indices = @transform_16, window_bounds = array<i64: 1, 1, 128>}, {pipeline_mode = #tpu.pipeline_mode<synchronous>, transform_indices = @transform_17, window_bounds = array<i64: 1, 128>}, {pipeline_mode = #tpu.pipeline_mode<synchronous>, transform_indices = @transform_18, window_bounds = array<i64: 1, 1>}, {pipeline_mode = #tpu.pipeline_mode<synchronous>, transform_indices = @transform_19, window_bounds = array<i64: 128, 128>}, {pipeline_mode = #tpu.pipeline_mode<synchronous>, transform_indices = @transform_20, window_bounds = array<i64: 1, 128>}, {pipeline_mode = #tpu.pipeline_mode<synchronous>, transform_indices = @transform_21, window_bounds = array<i64: 2, 128>}, {pipeline_mode = #tpu.pipeline_mode<synchronous>, transform_indices = @transform_22, window_bounds = array<i64: 1, 2>}, {pipeline_mode = #tpu.pipeline_mode<synchronous>, transform_indices = @transform_23, window_bounds = array<i64: 2, 2>}]} {
    %c0_i32 = arith.constant 0 : i32
    %0 = arith.cmpi eq, %arg0, %c0_i32 : i32
    %1 = arith.extui %0 : i1 to i32
    %c0_i32_0 = arith.constant 0 : i32
    %2 = arith.cmpi ne, %1, %c0_i32_0 : i32
    scf.if %2 {
      %c0_62 = arith.constant 0 : index
      %c0_63 = arith.constant 0 : index
      %153 = vector.load %arg1[%c0_62, %c0_63] : memref<16x128xf32, #tpu.memory_space<vmem>>, vector<16x128xf32>
      %154 = arith.truncf %153 : vector<16x128xf32> to vector<16x128xbf16>
      %c0_64 = arith.constant 0 : index
      %c0_65 = arith.constant 0 : index
      %155 = vector.load %arg4[%c0_64, %c0_65] : memref<128x128xbf16, #tpu.memory_space<vmem>>, vector<128x128xbf16>
      %cst_66 = arith.constant dense<0.000000e+00> : vector<16x128xf32>
      %156 = tpu.matmul %154, %155, %cst_66 {dimension_numbers = #tpu.dot_dimension_numbers<[1], [0], [0], [1], [0, 0, 1, 1], [], []>} : vector<16x128xbf16>, vector<128x128xbf16>, vector<16x128xf32> -> vector<16x128xf32>
      %c0_67 = arith.constant 0 : index
      %c0_68 = arith.constant 0 : index
      %157 = vector.load %arg5[%c0_67, %c0_68] : memref<1x128xf32, #tpu.memory_space<vmem>>, vector<1x128xf32>
      %158 = vector.broadcast %157 : vector<1x128xf32> to vector<16x128xf32>
      %159 = arith.addf %156, %158 : vector<16x128xf32>
      %c0_69 = arith.constant 0 : index
      %c0_70 = arith.constant 0 : index
      %160 = vector.load %arg2[%c0_69, %c0_70] : memref<16x128xf32, #tpu.memory_space<vmem>>, vector<16x128xf32>
      %161 = arith.addf %159, %160 : vector<16x128xf32>
      %c0_71 = arith.constant 0 : index
      %c0_72 = arith.constant 0 : index
      %162 = vector.load %arg25[%c0_71, %c0_72] : memref<16x128xf32, #tpu.memory_space<vmem>>, vector<16x128xf32>
      tpu.vector_store %arg25[%c0_71, %c0_72], %161 {strides = array<i32>} : memref<16x128xf32, #tpu.memory_space<vmem>>, vector<16x128xf32>,
    } else {
    }
    %c0 = arith.constant 0 : index
    %c0_1 = arith.constant 0 : index
    %3 = vector.load %arg25[%c0, %c0_1] : memref<16x128xf32, #tpu.memory_space<vmem>>, vector<16x128xf32>
    %4 = arith.truncf %3 : vector<16x128xf32> to vector<16x128xbf16>
    %c0_2 = arith.constant 0 : index
    %c0_3 = arith.constant 0 : index
    %c0_4 = arith.constant 0 : index
    %5 = vector.load %arg6[%c0_2, %c0_3, %c0_4] : memref<1x128x384xbf16, #tpu.memory_space<vmem>>, vector<1x128x384xbf16>
    %6 = vector.shape_cast %5 : vector<1x128x384xbf16> to vector<128x384xbf16>
    %cst = arith.constant dense<0.000000e+00> : vector<16x384xf32>
    %7 = tpu.matmul %4, %6, %cst {dimension_numbers = #tpu.dot_dimension_numbers<[1], [0], [0], [1], [0, 0, 1, 1], [], []>} : vector<16x128xbf16>, vector<128x384xbf16>, vector<16x384xf32> -> vector<16x384xf32>
    %c0_5 = arith.constant 0 : index
    %c0_6 = arith.constant 0 : index
    %c0_7 = arith.constant 0 : index
    %8 = vector.load %arg7[%c0_5, %c0_6, %c0_7] : memref<1x1x384xf32, #tpu.memory_space<vmem>>, vector<1x1x384xf32>
    %9 = vector.shape_cast %8 : vector<1x1x384xf32> to vector<1x384xf32>
    %10 = vector.broadcast %9 : vector<1x384xf32> to vector<16x384xf32>
    %11 = arith.addf %7, %10 : vector<16x384xf32>
    %12 = vector.extract_strided_slice %11 {offsets = [0, 0], sizes = [16, 128], strides = [1, 1]} : vector<16x384xf32> to vector<16x128xf32>
    %13 = vector.extract_strided_slice %11 {offsets = [0, 128], sizes = [16, 128], strides = [1, 1]} : vector<16x384xf32> to vector<16x128xf32>
    %14 = vector.extract_strided_slice %11 {offsets = [0, 256], sizes = [16, 128], strides = [1, 1]} : vector<16x384xf32> to vector<16x128xf32>
    %15 = vector.extract_strided_slice %12 {offsets = [0, 0], sizes = [16, 32], strides = [1, 1]} : vector<16x128xf32> to vector<16x32xf32>
    %16 = vector.shape_cast %15 : vector<16x32xf32> to vector<1x16x32xf32>
    %17 = vector.extract_strided_slice %12 {offsets = [0, 32], sizes = [16, 32], strides = [1, 1]} : vector<16x128xf32> to vector<16x32xf32>
    %18 = vector.shape_cast %17 : vector<16x32xf32> to vector<1x16x32xf32>
    %19 = vector.extract_strided_slice %12 {offsets = [0, 64], sizes = [16, 32], strides = [1, 1]} : vector<16x128xf32> to vector<16x32xf32>
    %20 = vector.shape_cast %19 : vector<16x32xf32> to vector<1x16x32xf32>
    %21 = vector.extract_strided_slice %12 {offsets = [0, 96], sizes = [16, 32], strides = [1, 1]} : vector<16x128xf32> to vector<16x32xf32>
    %22 = vector.shape_cast %21 : vector<16x32xf32> to vector<1x16x32xf32>
    %23 = tpu.concatenate %16, %18, %20, %22 in 0 : vector<1x16x32xf32>, vector<1x16x32xf32>, vector<1x16x32xf32>, vector<1x16x32xf32> -> vector<4x16x32xf32>
    %24 = vector.extract_strided_slice %13 {offsets = [0, 0], sizes = [16, 32], strides = [1, 1]} : vector<16x128xf32> to vector<16x32xf32>
    %25 = vector.shape_cast %24 : vector<16x32xf32> to vector<1x16x32xf32>
    %26 = vector.extract_strided_slice %13 {offsets = [0, 32], sizes = [16, 32], strides = [1, 1]} : vector<16x128xf32> to vector<16x32xf32>
    %27 = vector.shape_cast %26 : vector<16x32xf32> to vector<1x16x32xf32>
    %28 = vector.extract_strided_slice %13 {offsets = [0, 64], sizes = [16, 32], strides = [1, 1]} : vector<16x128xf32> to vector<16x32xf32>
    %29 = vector.shape_cast %28 : vector<16x32xf32> to vector<1x16x32xf32>
    %30 = vector.extract_strided_slice %13 {offsets = [0, 96], sizes = [16, 32], strides = [1, 1]} : vector<16x128xf32> to vector<16x32xf32>
    %31 = vector.shape_cast %30 : vector<16x32xf32> to vector<1x16x32xf32>
    %32 = tpu.concatenate %25, %27, %29, %31 in 0 : vector<1x16x32xf32>, vector<1x16x32xf32>, vector<1x16x32xf32>, vector<1x16x32xf32> -> vector<4x16x32xf32>
    %33 = vector.extract_strided_slice %14 {offsets = [0, 0], sizes = [16, 32], strides = [1, 1]} : vector<16x128xf32> to vector<16x32xf32>
    %34 = vector.shape_cast %33 : vector<16x32xf32> to vector<1x16x32xf32>
    %35 = vector.extract_strided_slice %14 {offsets = [0, 32], sizes = [16, 32], strides = [1, 1]} : vector<16x128xf32> to vector<16x32xf32>
    %36 = vector.shape_cast %35 : vector<16x32xf32> to vector<1x16x32xf32>
    %37 = vector.extract_strided_slice %14 {offsets = [0, 64], sizes = [16, 32], strides = [1, 1]} : vector<16x128xf32> to vector<16x32xf32>
    %38 = vector.shape_cast %37 : vector<16x32xf32> to vector<1x16x32xf32>
    %39 = vector.extract_strided_slice %14 {offsets = [0, 96], sizes = [16, 32], strides = [1, 1]} : vector<16x128xf32> to vector<16x32xf32>
    %40 = vector.shape_cast %39 : vector<16x32xf32> to vector<1x16x32xf32>
    %41 = tpu.concatenate %34, %36, %38, %40 in 0 : vector<1x16x32xf32>, vector<1x16x32xf32>, vector<1x16x32xf32>, vector<1x16x32xf32> -> vector<4x16x32xf32>
    %cst_8 = arith.constant dense<0.000000e+00> : vector<4x16x16xf32>
    %42 = tpu.matmul %23, %32, %cst_8 {dimension_numbers = #tpu.dot_dimension_numbers<[2], [2], [1], [1], [0, 0, 0, 1, 1, 1], [0], [0]>} : vector<4x16x32xf32>, vector<4x16x32xf32>, vector<4x16x16xf32> -> vector<4x16x16xf32>
    %cst_9 = arith.constant 0.176776692 : f32
    %43 = vector.broadcast %cst_9 : f32 to vector<4x16x16xf32>
    %44 = arith.mulf %42, %43 : vector<4x16x16xf32>
    %c0_10 = arith.constant 0 : index
    %c0_11 = arith.constant 0 : index
    %45 = vector.load %arg3[%c0_10, %c0_11] : memref<16x16xf32, #tpu.memory_space<vmem>>, vector<16x16xf32>
    %46 = vector.shape_cast %45 : vector<16x16xf32> to vector<1x16x16xf32>
    %47 = vector.broadcast %46 : vector<1x16x16xf32> to vector<4x16x16xf32>
    %48 = arith.addf %44, %47 : vector<4x16x16xf32>
    %cst_12 = arith.constant dense<0xFF800000> : vector<4x16xf32>
    %49 = vector.multi_reduction <maximumf>, %48, %cst_12 [2] : vector<4x16x16xf32> to vector<4x16xf32>
    %50 = vector.shape_cast %49 : vector<4x16xf32> to vector<4x16x1xf32>
    %51 = vector.broadcast %50 : vector<4x16x1xf32> to vector<4x16x16xf32>
    %52 = arith.subf %48, %51 : vector<4x16x16xf32>
    %53 = math.exp %52 : vector<4x16x16xf32>
    %cst_13 = arith.constant dense<0.000000e+00> : vector<4x16xf32>
    %54 = vector.multi_reduction <add>, %53, %cst_13 [2] : vector<4x16x16xf32> to vector<4x16xf32>
    %55 = vector.shape_cast %54 : vector<4x16xf32> to vector<4x16x1xf32>
    %56 = tpu.reciprocal %55 {approx = true} : vector<4x16x1xf32> -> vector<4x16x1xf32>
    %57 = vector.broadcast %56 : vector<4x16x1xf32> to vector<4x16x16xf32>
    %58 = arith.mulf %53, %57 : vector<4x16x16xf32>
    %cst_14 = arith.constant dense<0.000000e+00> : vector<4x16x32xf32>
    %59 = tpu.matmul %58, %41, %cst_14 {dimension_numbers = #tpu.dot_dimension_numbers<[2], [1], [1], [2], [0, 0, 0, 1, 1, 2], [0], [0]>} : vector<4x16x16xf32>, vector<4x16x32xf32>, vector<4x16x32xf32> -> vector<4x16x32xf32>
    %60 = vector.extract_strided_slice %59 {offsets = [0, 0, 0], sizes = [1, 16, 32], strides = [1, 1, 1]} : vector<4x16x32xf32> to vector<1x16x32xf32>
    %61 = vector.shape_cast %60 : vector<1x16x32xf32> to vector<16x32xf32>
    %62 = vector.extract_strided_slice %59 {offsets = [1, 0, 0], sizes = [1, 16, 32], strides = [1, 1, 1]} : vector<4x16x32xf32> to vector<1x16x32xf32>
    %63 = vector.shape_cast %62 : vector<1x16x32xf32> to vector<16x32xf32>
    %64 = vector.extract_strided_slice %59 {offsets = [2, 0, 0], sizes = [1, 16, 32], strides = [1, 1, 1]} : vector<4x16x32xf32> to vector<1x16x32xf32>
    %65 = vector.shape_cast %64 : vector<1x16x32xf32> to vector<16x32xf32>
    %66 = vector.extract_strided_slice %59 {offsets = [3, 0, 0], sizes = [1, 16, 32], strides = [1, 1, 1]} : vector<4x16x32xf32> to vector<1x16x32xf32>
    %67 = vector.shape_cast %66 : vector<1x16x32xf32> to vector<16x32xf32>
    %68 = tpu.concatenate %61, %63, %65, %67 in 1 : vector<16x32xf32>, vector<16x32xf32>, vector<16x32xf32>, vector<16x32xf32> -> vector<16x128xf32>
    %69 = arith.truncf %68 : vector<16x128xf32> to vector<16x128xbf16>
    %c0_15 = arith.constant 0 : index
    %c0_16 = arith.constant 0 : index
    %c0_17 = arith.constant 0 : index
    %70 = vector.load %arg8[%c0_15, %c0_16, %c0_17] : memref<1x128x128xbf16, #tpu.memory_space<vmem>>, vector<1x128x128xbf16>
    %71 = vector.shape_cast %70 : vector<1x128x128xbf16> to vector<128x128xbf16>
    %cst_18 = arith.constant dense<0.000000e+00> : vector<16x128xf32>
    %72 = tpu.matmul %69, %71, %cst_18 {dimension_numbers = #tpu.dot_dimension_numbers<[1], [0], [0], [1], [0, 0, 1, 1], [], []>} : vector<16x128xbf16>, vector<128x128xbf16>, vector<16x128xf32> -> vector<16x128xf32>
    %c0_19 = arith.constant 0 : index
    %c0_20 = arith.constant 0 : index
    %c0_21 = arith.constant 0 : index
    %73 = vector.load %arg9[%c0_19, %c0_20, %c0_21] : memref<1x1x128xf32, #tpu.memory_space<vmem>>, vector<1x1x128xf32>
    %74 = vector.shape_cast %73 : vector<1x1x128xf32> to vector<1x128xf32>
    %75 = vector.broadcast %74 : vector<1x128xf32> to vector<16x128xf32>
    %76 = arith.addf %72, %75 : vector<16x128xf32>
    %77 = arith.addf %3, %76 : vector<16x128xf32>
    %c0_22 = arith.constant 0 : index
    %c0_23 = arith.constant 0 : index
    %c0_24 = arith.constant 0 : index
    %78 = vector.load %arg10[%c0_22, %c0_23, %c0_24] : memref<1x1x128xf32, #tpu.memory_space<vmem>>, vector<1x1x128xf32>
    %79 = vector.shape_cast %78 : vector<1x1x128xf32> to vector<1x128xf32>
    %c0_25 = arith.constant 0 : index
    %c0_26 = arith.constant 0 : index
    %c0_27 = arith.constant 0 : index
    %80 = vector.load %arg11[%c0_25, %c0_26, %c0_27] : memref<1x1x128xf32, #tpu.memory_space<vmem>>, vector<1x1x128xf32>
    %81 = vector.shape_cast %80 : vector<1x1x128xf32> to vector<1x128xf32>
    %cst_28 = arith.constant dense<0.000000e+00> : vector<16xf32>
    %82 = vector.multi_reduction <add>, %77, %cst_28 [1] : vector<16x128xf32> to vector<16xf32>
    %83 = vector.shape_cast %82 : vector<16xf32> to vector<16x1xf32>
    %cst_29 = arith.constant 1.280000e+02 : f32
    %84 = vector.broadcast %cst_29 : f32 to vector<16x1xf32>
    %85 = arith.divf %83, %84 : vector<16x1xf32>
    %86 = vector.broadcast %85 : vector<16x1xf32> to vector<16x128xf32>
    %87 = arith.subf %77, %86 : vector<16x128xf32>
    %88 = arith.mulf %87, %87 : vector<16x128xf32>
    %cst_30 = arith.constant dense<0.000000e+00> : vector<16xf32>
    %89 = vector.multi_reduction <add>, %88, %cst_30 [1] : vector<16x128xf32> to vector<16xf32>
    %90 = vector.shape_cast %89 : vector<16xf32> to vector<16x1xf32>
    %cst_31 = arith.constant 1.280000e+02 : f32
    %91 = vector.broadcast %cst_31 : f32 to vector<16x1xf32>
    %92 = arith.divf %90, %91 : vector<16x1xf32>
    %93 = vector.broadcast %85 : vector<16x1xf32> to vector<16x128xf32>
    %94 = arith.subf %77, %93 : vector<16x128xf32>
    %cst_32 = arith.constant 9.99999974E-6 : f32
    %95 = vector.broadcast %cst_32 : f32 to vector<16x1xf32>
    %96 = arith.addf %92, %95 : vector<16x1xf32>
    %97 = math.rsqrt %96 : vector<16x1xf32>
    %98 = vector.broadcast %97 : vector<16x1xf32> to vector<16x128xf32>
    %99 = arith.mulf %94, %98 : vector<16x128xf32>
    %100 = vector.broadcast %79 : vector<1x128xf32> to vector<16x128xf32>
    %101 = arith.mulf %99, %100 : vector<16x128xf32>
    %102 = vector.broadcast %81 : vector<1x128xf32> to vector<16x128xf32>
    %103 = arith.addf %101, %102 : vector<16x128xf32>
    %104 = arith.truncf %103 : vector<16x128xf32> to vector<16x128xbf16>
    %c0_33 = arith.constant 0 : index
    %c0_34 = arith.constant 0 : index
    %c0_35 = arith.constant 0 : index
    %105 = vector.load %arg14[%c0_33, %c0_34, %c0_35] : memref<1x128x512xbf16, #tpu.memory_space<vmem>>, vector<1x128x512xbf16>
    %106 = vector.shape_cast %105 : vector<1x128x512xbf16> to vector<128x512xbf16>
    %cst_36 = arith.constant dense<0.000000e+00> : vector<16x512xf32>
    %107 = tpu.matmul %104, %106, %cst_36 {dimension_numbers = #tpu.dot_dimension_numbers<[1], [0], [0], [1], [0, 0, 1, 1], [], []>} : vector<16x128xbf16>, vector<128x512xbf16>, vector<16x512xf32> -> vector<16x512xf32>
    %c0_37 = arith.constant 0 : index
    %c0_38 = arith.constant 0 : index
    %c0_39 = arith.constant 0 : index
    %108 = vector.load %arg15[%c0_37, %c0_38, %c0_39] : memref<1x1x512xf32, #tpu.memory_space<vmem>>, vector<1x1x512xf32>
    %109 = vector.shape_cast %108 : vector<1x1x512xf32> to vector<1x512xf32>
    %110 = vector.broadcast %109 : vector<1x512xf32> to vector<16x512xf32>
    %111 = arith.addf %107, %110 : vector<16x512xf32>
    %cst_40 = arith.constant 0.000000e+00 : f32
    %112 = vector.broadcast %cst_40 : f32 to vector<16x512xf32>
    %113 = arith.maximumf %111, %112 : vector<16x512xf32>
    %114 = arith.truncf %113 : vector<16x512xf32> to vector<16x512xbf16>
    %c0_41 = arith.constant 0 : index
    %c0_42 = arith.constant 0 : index
    %c0_43 = arith.constant 0 : index
    %115 = vector.load %arg16[%c0_41, %c0_42, %c0_43] : memref<1x512x128xbf16, #tpu.memory_space<vmem>>, vector<1x512x128xbf16>
    %116 = vector.shape_cast %115 : vector<1x512x128xbf16> to vector<512x128xbf16>
    %cst_44 = arith.constant dense<0.000000e+00> : vector<16x128xf32>
    %117 = tpu.matmul %114, %116, %cst_44 {dimension_numbers = #tpu.dot_dimension_numbers<[1], [0], [0], [1], [0, 0, 1, 1], [], []>} : vector<16x512xbf16>, vector<512x128xbf16>, vector<16x128xf32> -> vector<16x128xf32>
    %c0_45 = arith.constant 0 : index
    %c0_46 = arith.constant 0 : index
    %c0_47 = arith.constant 0 : index
    %118 = vector.load %arg17[%c0_45, %c0_46, %c0_47] : memref<1x1x128xf32, #tpu.memory_space<vmem>>, vector<1x1x128xf32>
    %119 = vector.shape_cast %118 : vector<1x1x128xf32> to vector<1x128xf32>
    %120 = vector.broadcast %119 : vector<1x128xf32> to vector<16x128xf32>
    %121 = arith.addf %117, %120 : vector<16x128xf32>
    %122 = arith.addf %103, %121 : vector<16x128xf32>
    %c0_48 = arith.constant 0 : index
    %c0_49 = arith.constant 0 : index
    %c0_50 = arith.constant 0 : index
    %123 = vector.load %arg12[%c0_48, %c0_49, %c0_50] : memref<1x1x128xf32, #tpu.memory_space<vmem>>, vector<1x1x128xf32>
    %124 = vector.shape_cast %123 : vector<1x1x128xf32> to vector<1x128xf32>
    %c0_51 = arith.constant 0 : index
    %c0_52 = arith.constant 0 : index
    %c0_53 = arith.constant 0 : index
    %125 = vector.load %arg13[%c0_51, %c0_52, %c0_53] : memref<1x1x128xf32, #tpu.memory_space<vmem>>, vector<1x1x128xf32>
    %126 = vector.shape_cast %125 : vector<1x1x128xf32> to vector<1x128xf32>
    %cst_54 = arith.constant dense<0.000000e+00> : vector<16xf32>
    %127 = vector.multi_reduction <add>, %122, %cst_54 [1] : vector<16x128xf32> to vector<16xf32>
    %128 = vector.shape_cast %127 : vector<16xf32> to vector<16x1xf32>
    %cst_55 = arith.constant 1.280000e+02 : f32
    %129 = vector.broadcast %cst_55 : f32 to vector<16x1xf32>
    %130 = arith.divf %128, %129 : vector<16x1xf32>
    %131 = vector.broadcast %130 : vector<16x1xf32> to vector<16x128xf32>
    %132 = arith.subf %122, %131 : vector<16x128xf32>
    %133 = arith.mulf %132, %132 : vector<16x128xf32>
    %cst_56 = arith.constant dense<0.000000e+00> : vector<16xf32>
    %134 = vector.multi_reduction <add>, %133, %cst_56 [1] : vector<16x128xf32> to vector<16xf32>
    %135 = vector.shape_cast %134 : vector<16xf32> to vector<16x1xf32>
    %cst_57 = arith.constant 1.280000e+02 : f32
    %136 = vector.broadcast %cst_57 : f32 to vector<16x1xf32>
    %137 = arith.divf %135, %136 : vector<16x1xf32>
    %138 = vector.broadcast %130 : vector<16x1xf32> to vector<16x128xf32>
    %139 = arith.subf %122, %138 : vector<16x128xf32>
    %cst_58 = arith.constant 9.99999974E-6 : f32
    %140 = vector.broadcast %cst_58 : f32 to vector<16x1xf32>
    %141 = arith.addf %137, %140 : vector<16x1xf32>
    %142 = math.rsqrt %141 : vector<16x1xf32>
    %143 = vector.broadcast %142 : vector<16x1xf32> to vector<16x128xf32>
    %144 = arith.mulf %139, %143 : vector<16x128xf32>
    %145 = vector.broadcast %124 : vector<1x128xf32> to vector<16x128xf32>
    %146 = arith.mulf %144, %145 : vector<16x128xf32>
    %147 = vector.broadcast %126 : vector<1x128xf32> to vector<16x128xf32>
    %148 = arith.addf %146, %147 : vector<16x128xf32>
    %c0_59 = arith.constant 0 : index
    %c0_60 = arith.constant 0 : index
    %149 = vector.load %arg25[%c0_59, %c0_60] : memref<16x128xf32, #tpu.memory_space<vmem>>, vector<16x128xf32>
    tpu.vector_store %arg25[%c0_59, %c0_60], %148 {strides = array<i32>} : memref<16x128xf32, #tpu.memory_space<vmem>>, vector<16x128xf32>,
    %c3_i32 = arith.constant 3 : i32
    %150 = arith.cmpi eq, %arg0, %c3_i32 : i32
    %151 = arith.extui %150 : i1 to i32
    %c0_i32_61 = arith.constant 0 : i32
    %152 = arith.cmpi ne, %151, %c0_i32_61 : i32
    scf.if %152 {
      %153 = vector.shape_cast %148 : vector<16x128xf32> to vector<2x8x128xf32>
      %c0_62 = arith.constant 0 : index
      %c0_63 = arith.constant 0 : index
      %154 = vector.load %arg18[%c0_62, %c0_63] : memref<1x128xf32, #tpu.memory_space<vmem>>, vector<1x128xf32>
      %155 = vector.shape_cast %154 : vector<1x128xf32> to vector<1x1x128xf32>
      %156 = vector.broadcast %155 : vector<1x1x128xf32> to vector<2x8x128xf32>
      %157 = arith.mulf %153, %156 : vector<2x8x128xf32>
      %cst_64 = arith.constant dense<0.000000e+00> : vector<2x8xf32>
      %158 = vector.multi_reduction <add>, %157, %cst_64 [2] : vector<2x8x128xf32> to vector<2x8xf32>
      %159 = vector.shape_cast %158 : vector<2x8xf32> to vector<2x8x1xf32>
      %c0_65 = arith.constant 0 : index
      %c0_66 = arith.constant 0 : index
      %160 = vector.load %arg19[%c0_65, %c0_66] : memref<1x1xf32, #tpu.memory_space<vmem>>, vector<1x1xf32>
      %161 = vector.shape_cast %160 : vector<1x1xf32> to vector<1x1x1xf32>
      %162 = vector.broadcast %161 : vector<1x1x1xf32> to vector<2x8x1xf32>
      %163 = arith.addf %159, %162 : vector<2x8x1xf32>
      %cst_67 = arith.constant dense<0xFF800000> : vector<2x1xf32>
      %164 = vector.multi_reduction <maximumf>, %163, %cst_67 [1] : vector<2x8x1xf32> to vector<2x1xf32>
      %165 = vector.shape_cast %164 : vector<2x1xf32> to vector<2x1x1xf32>
      %166 = vector.broadcast %165 : vector<2x1x1xf32> to vector<2x8x1xf32>
      %167 = arith.subf %163, %166 : vector<2x8x1xf32>
      %168 = math.exp %167 : vector<2x8x1xf32>
      %cst_68 = arith.constant dense<0.000000e+00> : vector<2x1xf32>
      %169 = vector.multi_reduction <add>, %168, %cst_68 [1] : vector<2x8x1xf32> to vector<2x1xf32>
      %170 = vector.shape_cast %169 : vector<2x1xf32> to vector<2x1x1xf32>
      %171 = tpu.reciprocal %170 {approx = true} : vector<2x1x1xf32> -> vector<2x1x1xf32>
      %172 = vector.broadcast %171 : vector<2x1x1xf32> to vector<2x8x1xf32>
      %173 = arith.mulf %168, %172 : vector<2x8x1xf32>
      %174 = vector.broadcast %173 : vector<2x8x1xf32> to vector<2x8x128xf32>
      %175 = arith.mulf %153, %174 : vector<2x8x128xf32>
      %cst_69 = arith.constant dense<0.000000e+00> : vector<2x128xf32>
      %176 = vector.multi_reduction <add>, %175, %cst_69 [1] : vector<2x8x128xf32> to vector<2x128xf32>
      %177 = arith.truncf %176 : vector<2x128xf32> to vector<2x128xbf16>
      %c0_70 = arith.constant 0 : index
      %c0_71 = arith.constant 0 : index
      %178 = vector.load %arg20[%c0_70, %c0_71] : memref<128x128xbf16, #tpu.memory_space<vmem>>, vector<128x128xbf16>
      %cst_72 = arith.constant dense<0.000000e+00> : vector<2x128xf32>
      %179 = tpu.matmul %177, %178, %cst_72 {dimension_numbers = #tpu.dot_dimension_numbers<[1], [0], [0], [1], [0, 0, 1, 1], [], []>} : vector<2x128xbf16>, vector<128x128xbf16>, vector<2x128xf32> -> vector<2x128xf32>
      %c0_73 = arith.constant 0 : index
      %c0_74 = arith.constant 0 : index
      %180 = vector.load %arg21[%c0_73, %c0_74] : memref<1x128xf32, #tpu.memory_space<vmem>>, vector<1x128xf32>
      %181 = vector.broadcast %180 : vector<1x128xf32> to vector<2x128xf32>
      %182 = arith.addf %179, %181 : vector<2x128xf32>
      %cst_75 = arith.constant 0.000000e+00 : f32
      %183 = vector.broadcast %cst_75 : f32 to vector<2x128xf32>
      %184 = arith.maximumf %182, %183 : vector<2x128xf32>
      %c0_76 = arith.constant 0 : index
      %c0_77 = arith.constant 0 : index
      %185 = vector.load %arg22[%c0_76, %c0_77] : memref<2x128xf32, #tpu.memory_space<vmem>>, vector<2x128xf32>
      %cst_78 = arith.constant dense<0.000000e+00> : vector<2x2xf32>
      %186 = tpu.matmul %184, %185, %cst_78 {dimension_numbers = #tpu.dot_dimension_numbers<[1], [1], [0], [0], [0, 0, 1, 0], [], []>} : vector<2x128xf32>, vector<2x128xf32>, vector<2x2xf32> -> vector<2x2xf32>
      %c0_79 = arith.constant 0 : index
      %c0_80 = arith.constant 0 : index
      %187 = vector.load %arg23[%c0_79, %c0_80] : memref<1x2xf32, #tpu.memory_space<vmem>>, vector<1x2xf32>
      %188 = vector.broadcast %187 : vector<1x2xf32> to vector<2x2xf32>
      %189 = arith.addf %186, %188 : vector<2x2xf32>
      %c0_81 = arith.constant 0 : index
      %c0_82 = arith.constant 0 : index
      %190 = vector.load %arg24[%c0_81, %c0_82] : memref<2x2xf32, #tpu.memory_space<vmem>>, vector<2x2xf32>
      tpu.vector_store %arg24[%c0_81, %c0_82], %189 {strides = array<i32>} : memref<2x2xf32, #tpu.memory_space<vmem>>, vector<2x2xf32>,
    } else {
    }
    return
  }
  func.func @transform_0(%arg0: i32) -> (i32, i32) {
    %c0_i32 = arith.constant 0 : i32
    %c0_i32_0 = arith.constant 0 : i32
    %c0_i32_1 = arith.constant 0 : i32
    return %c0_i32, %c0_i32_0 : i32, i32
  }
  func.func @transform_1(%arg0: i32) -> (i32, i32) {
    %c0_i32 = arith.constant 0 : i32
    %c0_i32_0 = arith.constant 0 : i32
    %c0_i32_1 = arith.constant 0 : i32
    return %c0_i32, %c0_i32_0 : i32, i32
  }
  func.func @transform_2(%arg0: i32) -> (i32, i32) {
    %c0_i32 = arith.constant 0 : i32
    %c0_i32_0 = arith.constant 0 : i32
    %c0_i32_1 = arith.constant 0 : i32
    return %c0_i32, %c0_i32_0 : i32, i32
  }
  func.func @transform_3(%arg0: i32) -> (i32, i32) {
    %c0_i32 = arith.constant 0 : i32
    %c0_i32_0 = arith.constant 0 : i32
    %c0_i32_1 = arith.constant 0 : i32
    return %c0_i32, %c0_i32_0 : i32, i32
  }
  func.func @transform_4(%arg0: i32) -> (i32, i32) {
    %c0_i32 = arith.constant 0 : i32
    %c0_i32_0 = arith.constant 0 : i32
    %c0_i32_1 = arith.constant 0 : i32
    return %c0_i32, %c0_i32_0 : i32, i32
  }
  func.func @transform_5(%arg0: i32) -> (i32, i32, i32) {
    %c0_i32 = arith.constant 0 : i32
    %c0_i32_0 = arith.constant 0 : i32
    %c0_i32_1 = arith.constant 0 : i32
    return %arg0, %c0_i32, %c0_i32_0 : i32, i32, i32
  }
  func.func @transform_6(%arg0: i32) -> (i32, i32, i32) {
    %c0_i32 = arith.constant 0 : i32
    %c0_i32_0 = arith.constant 0 : i32
    %c0_i32_1 = arith.constant 0 : i32
    return %arg0, %c0_i32, %c0_i32_0 : i32, i32, i32
  }
  func.func @transform_7(%arg0: i32) -> (i32, i32, i32) {
    %c0_i32 = arith.constant 0 : i32
    %c0_i32_0 = arith.constant 0 : i32
    %c0_i32_1 = arith.constant 0 : i32
    return %arg0, %c0_i32, %c0_i32_0 : i32, i32, i32
  }
  func.func @transform_8(%arg0: i32) -> (i32, i32, i32) {
    %c0_i32 = arith.constant 0 : i32
    %c0_i32_0 = arith.constant 0 : i32
    %c0_i32_1 = arith.constant 0 : i32
    return %arg0, %c0_i32, %c0_i32_0 : i32, i32, i32
  }
  func.func @transform_9(%arg0: i32) -> (i32, i32, i32) {
    %c0_i32 = arith.constant 0 : i32
    %c0_i32_0 = arith.constant 0 : i32
    %c0_i32_1 = arith.constant 0 : i32
    return %arg0, %c0_i32, %c0_i32_0 : i32, i32, i32
  }
  func.func @transform_10(%arg0: i32) -> (i32, i32, i32) {
    %c0_i32 = arith.constant 0 : i32
    %c0_i32_0 = arith.constant 0 : i32
    %c0_i32_1 = arith.constant 0 : i32
    return %arg0, %c0_i32, %c0_i32_0 : i32, i32, i32
  }
  func.func @transform_11(%arg0: i32) -> (i32, i32, i32) {
    %c0_i32 = arith.constant 0 : i32
    %c0_i32_0 = arith.constant 0 : i32
    %c0_i32_1 = arith.constant 0 : i32
    return %arg0, %c0_i32, %c0_i32_0 : i32, i32, i32
  }
  func.func @transform_12(%arg0: i32) -> (i32, i32, i32) {
    %c0_i32 = arith.constant 0 : i32
    %c0_i32_0 = arith.constant 0 : i32
    %c0_i32_1 = arith.constant 0 : i32
    return %arg0, %c0_i32, %c0_i32_0 : i32, i32, i32
  }
  func.func @transform_13(%arg0: i32) -> (i32, i32, i32) {
    %c0_i32 = arith.constant 0 : i32
    %c0_i32_0 = arith.constant 0 : i32
    %c0_i32_1 = arith.constant 0 : i32
    return %arg0, %c0_i32, %c0_i32_0 : i32, i32, i32
  }
  func.func @transform_14(%arg0: i32) -> (i32, i32, i32) {
    %c0_i32 = arith.constant 0 : i32
    %c0_i32_0 = arith.constant 0 : i32
    %c0_i32_1 = arith.constant 0 : i32
    return %arg0, %c0_i32, %c0_i32_0 : i32, i32, i32
  }
  func.func @transform_15(%arg0: i32) -> (i32, i32, i32) {
    %c0_i32 = arith.constant 0 : i32
    %c0_i32_0 = arith.constant 0 : i32
    %c0_i32_1 = arith.constant 0 : i32
    return %arg0, %c0_i32, %c0_i32_0 : i32, i32, i32
  }
  func.func @transform_16(%arg0: i32) -> (i32, i32, i32) {
    %c0_i32 = arith.constant 0 : i32
    %c0_i32_0 = arith.constant 0 : i32
    %c0_i32_1 = arith.constant 0 : i32
    return %arg0, %c0_i32, %c0_i32_0 : i32, i32, i32
  }
  func.func @transform_17(%arg0: i32) -> (i32, i32) {
    %c0_i32 = arith.constant 0 : i32
    %c0_i32_0 = arith.constant 0 : i32
    %c0_i32_1 = arith.constant 0 : i32
    return %c0_i32, %c0_i32_0 : i32, i32
  }
  func.func @transform_18(%arg0: i32) -> (i32, i32) {
    %c0_i32 = arith.constant 0 : i32
    %c0_i32_0 = arith.constant 0 : i32
    %c0_i32_1 = arith.constant 0 : i32
    return %c0_i32, %c0_i32_0 : i32, i32
  }
  func.func @transform_19(%arg0: i32) -> (i32, i32) {
    %c0_i32 = arith.constant 0 : i32
    %c0_i32_0 = arith.constant 0 : i32
    %c0_i32_1 = arith.constant 0 : i32
    return %c0_i32, %c0_i32_0 : i32, i32
  }
  func.func @transform_20(%arg0: i32) -> (i32, i32) {
    %c0_i32 = arith.constant 0 : i32
    %c0_i32_0 = arith.constant 0 : i32
    %c0_i32_1 = arith.constant 0 : i32
    return %c0_i32, %c0_i32_0 : i32, i32
  }
  func.func @transform_21(%arg0: i32) -> (i32, i32) {
    %c0_i32 = arith.constant 0 : i32
    %c0_i32_0 = arith.constant 0 : i32
    %c0_i32_1 = arith.constant 0 : i32
    return %c0_i32, %c0_i32_0 : i32, i32
  }
  func.func @transform_22(%arg0: i32) -> (i32, i32) {
    %c0_i32 = arith.constant 0 : i32
    %c0_i32_0 = arith.constant 0 : i32
    %c0_i32_1 = arith.constant 0 : i32
    return %c0_i32, %c0_i32_0 : i32, i32
  }
  func.func @transform_23(%arg0: i32) -> (i32, i32) {
    %c0_i32 = arith.constant 0 : i32
    %c0_i32_0 = arith.constant 0 : i32
    %c0_i32_1 = arith.constant 0 : i32
    return %c0_i32, %c0_i32_0 : i32, i32
  }
}

</mosaic_0001>

<bundles_post_ra>
// kernel: tpu_custom_call.1
= control target key start
LH: loop header
LB: loop body
LE: loop exit
PB: predicated region body
PF: predicated region fallthrough
CT: control target
= control target key end

     0   :  { %s5895_s0 = inlined_call_operand.hbm [shape: f32[16,128], index: 0, kind: input, shape index: {}]   ;;  %s5896_s1 = inlined_call_operand.hbm [shape: f32[16,128], index: 1, kind: input, shape index: {}]   ;;  %s5897_s2 = inlined_call_operand.hbm [shape: f32[16,16], index: 2, kind: input, shape index: {}]   ;;  %s5898_s3 = inlined_call_operand.hbm [shape: bf16[128,128], index: 3, kind: input, shape index: {}]   ;;  %s5899_s4 = inlined_call_operand.vmem [shape: f32[1,128], index: 4, kind: input, shape index: {}]   ;;  %s5900_s5 = inlined_call_operand.hbm [shape: bf16[4,128,384], index: 5, kind: input, shape index: {}]   ;;  %s5901_s6 = inlined_call_operand.hbm [shape: f32[4,1,384], index: 6, kind: input, shape index: {}]   ;;  %s5902_s7 = inlined_call_operand.hbm [shape: bf16[4,128,128], index: 7, kind: input, shape index: {}]   ;;  %s5903_s8 = inlined_call_operand.vmem [shape: f32[4,1,128], index: 8, kind: input, shape index: {}]   ;;  %s5904_s9 = inlined_call_operand.vmem [shape: f32[4,1,128], index: 9, kind: input, shape index: {}]   ;;  %s5905_s10 = inlined_call_operand.hbm [shape: f32[4,1,128], index: 10, kind: input, shape index: {}]   ;;  %s5906_s11 = inlined_call_operand.hbm [shape: f32[4,1,128], index: 11, kind: input, shape index: {}]   ;;  %s5907_s12 = inlined_call_operand.hbm [shape: f32[4,1,128], index: 12, kind: input, shape index: {}]   ;;  %s5908_s13 = inlined_call_operand.hbm [shape: bf16[4,128,512], index: 13, kind: input, shape index: {}]   ;;  %s5909_s14 = inlined_call_operand.vmem [shape: f32[4,1,512], index: 14, kind: input, shape index: {}]   ;;  %s5910_s15 = inlined_call_operand.hbm [shape: bf16[4,512,128], index: 15, kind: input, shape index: {}]   ;;  %s5911_s16 = inlined_call_operand.vmem [shape: f32[4,1,128], index: 16, kind: input, shape index: {}]   ;;  %s5912_s17 = inlined_call_operand.vmem [shape: f32[1,128], index: 17, kind: input, shape index: {}]   ;;  %s5913_s18 = inlined_call_operand.<no memory space> [shape: f32[1,1], index: 18, kind: input, shape index: {}]   ;;  %s5914_s19 = inlined_call_operand.hbm [shape: bf16[128,128], index: 19, kind: input, shape index: {}]   ;;  %s5915_s20 = inlined_call_operand.vmem [shape: f32[1,128], index: 20, kind: input, shape index: {}]   ;;  %s5916_s21 = inlined_call_operand.vmem [shape: f32[2,128], index: 21, kind: input, shape index: {}]   ;;  %s5917_s22 = inlined_call_operand.vmem [shape: f32[1,2], index: 22, kind: input, shape index: {}]   ;;  %s5918_s23 = inlined_call_operand.hbm [shape: f32[2,2], index: 23, kind: output, shape index: {}]  }
   0x1   :  { %5946 = sst [smem:[#allocation34_spill]] %s5895_s0  ;;  %v28_v0 = vstv %s5913_s18 }
   0x2   :  { %5947 = sst [smem:[#allocation35_spill]] %s5896_s1  ;;  %29 = vst [vmem:[#allocation3] sm:$0x1] %v28_v0 }
   0x3   :  { %5948 = sst [smem:[#allocation36_spill]] %s5897_s2 }
   0x4   :  { %5949 = sst [smem:[#allocation37_spill]] %s5898_s3 }
   0x5   :  { %5950 = sst [smem:[#allocation38_spill]] %s5899_s4 }
   0x6   :  { %5951 = sst [smem:[#allocation39_spill]] %s5900_s5 }
   0x7   :  { %5952 = sst [smem:[#allocation40_spill]] %s5901_s6 }
   0x8   :  { %5953 = sst [smem:[#allocation41_spill]] %s5902_s7 }
   0x9   :  { %5954 = sst [smem:[#allocation42_spill]] %s5903_s8 }
   0xa   :  { %5955 = sst [smem:[#allocation43_spill]] %s5904_s9 }
   0xb   :  { %5956 = sst [smem:[#allocation44_spill]] %s5905_s10 }
   0xc   :  { %5957 = sst [smem:[#allocation45_spill]] %s5909_s14 }
   0xd   :  { %5958 = sst [smem:[#allocation46_spill]] %s5911_s16 }
   0xe   :  { %5959 = sst [smem:[#allocation47_spill]] %s5912_s17 }
   0xf   :  { %5960 = sst [smem:[#allocation48_spill]] %s5915_s20 }
  0x10   :  { %5961 = sst [smem:[#allocation49_spill]] %s5916_s21 }
  0x11   :  { %5962 = sst [smem:[#allocation50_spill]] %s5917_s22 }
  0x12   :  { %5963 = sst [smem:[#allocation51_spill]] %s5918_s23 }
  0x13   :  { %30 = vsyncpa [#allocation5], 0 }
  0x14   :  { %31 = vsyncpa [#allocation8], 0 }
  0x15   :  { %32 = vsyncpa [#allocation11], 0 }
  0x16   :  { %33 = vsyncpa [#allocation6], 0  ;;  %s5135_s24 = smov 0   ;;  %s5137_s25 = smov 0  }
  0x17   :  { %s5139_s5 = smov 0   ;;  %s5141_s1 = smov 0  }
  0x18 LB: > { %5964 = sst [smem:[#allocation28_spill]] %s4969_s25  ;;  %s5154_s18 = sadd.s32 4294967295, %s4977_s1   ;;  %s4977_s1 = sphi %s5141_s1, %s6026_s1   ;;  %s4973_s5 = sphi %s5139_s5, %s6029_s5   ;;  %s4969_s25 = sphi %s5137_s25, %s6028_s25   ;;  %s4965_s24 = sphi %s5135_s24, %s6027_s24  }
  0x19   : > { %5965 = sst [smem:[#allocation29_spill]] %s4973_s5  ;;  %s5157_s26 = sadd.s32 1, %s4977_s1  }
  0x1a   : > { %5966 = sst [smem:[#allocation30_spill]] %s5154_s18  ;;  %s148_s2 = ssub.s32 %s4977_s1, %s5157_s26 }
  0x1b   : > { %5967 = sst [smem:[#allocation31_spill]] %s5157_s26  ;;  %s151_s6 = sadd.s32 1, %s4973_s5 }
  0x1c   : > { %p149_p0 = scmp.eq.s32.totalorder %s148_s2, 0  ;;  %p158_p1 = scmp.ne.s32.totalorder %s4973_s5, %s4969_s25 }
  0x1d   : > { %p159_p2 = scmp.eq.s32.totalorder %s4977_s1, 0  ;;  %p164_p3 = scmp.ne.s32.totalorder %s4969_s25, %s4965_s24 }
  0x1e   : > { %s5167_s27 = scalar_select %p149_p0, %s4973_s5, %s151_s6  }
  0x1f   : > { %p5169_p4 = por %p159_p2, %p158_p1  ;;  %p5922_p5 = scmp.eq.s32.totalorder %s5154_s18, 0 }
  0x20   : > { %5968 = sst [smem:[#allocation32_spill]] %s5167_s27  ;;  %p3745_p6 = scmp.ge.s32.totalorder %s4977_s1, 1 }
  0x21   : > { %p608_p7 = scmp.lt.s32.totalorder %s4977_s1, 5  ;;  %p5178_p8 = por %p5922_p5, %p164_p3 }
  0x22   : > { %s4979_s3 = smov [#allocation4]   ;;  %p4279_p13 = scmp.lt.s32.totalorder %s4977_s1, 4 }
  0x23   : > { %s5970_s28 = scalar_select %p5178_p8, 1, 0 }
  0x24   : > { %p5183_p10 = pnand %p3745_p6, %p608_p7  ;;  %s620_s0 = sshll.u32 %s4979_s3, 4  ;;  %s621_s0 = int_to_ptr.vmem [resolvable:$true] %s620_s0 }
  0x25   : > { %5971 = sst [smem:[#allocation33_spill]] %s5970_s28  ;;  %s704_s30 = sand.u32 1, %s4977_s1  }
  0x26   : > { %s5972_s29 = scalar_select %p5183_p10, 1, 0 }
  0x27   : > { %p4233_p11 = pneg %p5183_p10  ;;  %s5198_s24 = sand.u32 1, %s4973_s5  }
  0x28   : > { %p5202_p0 = pnand %p4279_p13, %p5169_p4  ;;  %s4556_s3 = scalar_lea.vmem %s621_s0, 256 }
  0x29   : > { %p5191_p12 = pnand %p4233_p11, %p5922_p5  ;;  %p4557_p2 = scmp.ne.s32.totalorder %s621_s0, %s4556_s3 }
  0x2a   : > { %p4564_p7 = scmp.lt.s32.totalorder %s621_s0, %s621_s0  ;;  %p4565_p11 = scmp.lt.s32.totalorder %s4556_s3, %s4556_s3 }
  0x2b   : > { %s5973_s4 = scalar_select %p5191_p12, 1, 0 }
  0x2c   : > { %p5208_p1 = pneg %p5191_p12  ;;  %p4566_p9 = por %p4565_p11, %p4564_p7 }
  0x2e   : > { %s5975_s6 = scalar_select %p5208_p1, 1, 0 }
  0x2f   : > { %p4559_p3 = pnand %p4557_p2, %p5208_p1 }
  0x31   : > { %p4560_p6 = pneg %p4559_p3 }
  0x33   : > { %p4567_p5 = pnand %p4566_p9, %p4560_p6 }
  0x35   : > { %4570 = shalt.err (!%p4567_p5)
}
  0x36   : > { %s5935_s7 = smov 128   ;;  %s5937_s27 = smov 8  }
  0x37   : > { %s5976_s23 = sld [smem:[#allocation34_spill]]  ;;  %s4187_s22 = smul.u32 192, %s5198_s24 }
  0x38   : > { %s4188_s3 = smul.u32 3072, %s4977_s1  ;;  %s5977_s14 = sld [smem:[#allocation39_spill]] }
  0x39   : > { %s4189_s20 = smul.u32 3, %s5198_s24  ;;  %s708_s9 = scalar_lea.vmem [#allocation12], %s4187_s22 }
  0x3a   : > { %s715_s8 = sshll.u32 %s708_s9, 4  ;;  %s5232_s28 = scalar_lea.sflag [#allocation5], %s704_s30  ;;  %s5230_s8 = int_to_ptr.vmem [resolvable:$true] %s715_s8 }
  0x3b   : > { %p5238_p5 = pneg %p5202_p0 }
  0x3d   : > { %4236 = dma.hbm_to_vmem [thread:$0]  (!%p5191_p12), %s5976_s23, 256, %s621_s0, [#allocation5], %s5935_s7, %s5935_s7, %s5937_s27  }
  0x3e   : > { %s5228_s16 = scalar_lea.hbm %s5977_s14, %s4188_s3  ;;  %s4576_s22 = scalar_lea.hbm %s5977_s14, 12288 }
  0x3f   : > { %s4571_s25 = scalar_lea.hbm %s5228_s16, 3072  ;;  %p4577_p2 = scmp.lt.s32.totalorder %s5228_s16, %s5977_s14 }
  0x40   : > { %p4572_p4 = scmp.ne.s32.totalorder %s5228_s16, %s4571_s25  ;;  %p4578_p3 = scmp.lt.s32.totalorder %s4576_s22, %s4571_s25 }
  0x42   : > { %p4574_p9 = pnand %p5238_p5, %p4572_p4  ;;  %p4579_p6 = por %p4578_p3, %p4577_p2 }
  0x44   : > { %p4575_p13 = pneg %p4574_p9 }
  0x46   : > { %p4580_p7 = pnand %p4579_p6, %p4575_p13 }
  0x48   : > { %4583 = shalt.err (!%p4580_p7)
}
  0x49   : > { %s4584_s26 = scalar_lea.vmem %s5230_s8, 3072  ;;  %s4982_s0 = smov [#allocation12]  }
  0x4a   : > { %p4585_p11 = scmp.ne.s32.totalorder %s5230_s8, %s4584_s26  ;;  %s4589_s30 = sshll.u32 %s4982_s0, 4  ;;  %s4590_s30 = int_to_ptr.vmem [resolvable:$false] %s4589_s30 }
  0x4b   : > { %s4591_s3 = scalar_lea.vmem %s4590_s30, 6144  ;;  %p4592_p8 = scmp.lt.s32.totalorder %s5230_s8, %s4590_s30 }
  0x4c   : > { %p4587_p4 = pnand %p4585_p11, %p5238_p5  ;;  %p4593_p10 = scmp.lt.s32.totalorder %s4591_s3, %s4584_s26 }
  0x4e   : > { %p4588_p9 = pneg %p4587_p4  ;;  %p4594_p12 = por %p4593_p10, %p4592_p8 }
  0x50   : > { %p4595_p1 = pnand %p4594_p12, %p4588_p9 }
  0x52   : > { %4598 = shalt.err (!%p4595_p1)
}
  0x53   : > { %s4983_s25 = smov 192   ;;  %s4984_s17 = smov 12  }
  0x54   : > { %4252 = dma.hbm_to_vmem [thread:$0]  (!%p5202_p0), %s5228_s16, 3072, %s5230_s8, %s5232_s28, %s4983_s25, %s4983_s25, %s4984_s17  }
  0x55   : > { %s4190_s21 = smul.u32 48, %s4977_s1  ;;  %s729_s22 = scalar_lea.vmem [#allocation13], %s4189_s20 }
  0x56   : > { %s737_s9 = sshll.u32 %s729_s22, 4  ;;  %s5979_s0 = sld [smem:[#allocation40_spill]]  ;;  %s738_s9 = int_to_ptr.vmem [resolvable:$true] %s737_s9 }
  0x5c   : > { %s735_s30 = scalar_lea.hbm %s5979_s0, %s4190_s21  ;;  %s4604_s14 = scalar_lea.hbm %s5979_s0, 192 }
  0x5d   : > { %s4599_s3 = scalar_lea.hbm %s735_s30, 48  ;;  %p4605_p1 = scmp.lt.s32.totalorder %s735_s30, %s5979_s0 }
  0x5e   : > { %p4600_p8 = scmp.ne.s32.totalorder %s735_s30, %s4599_s3  ;;  %p4606_p13 = scmp.lt.s32.totalorder %s4604_s14, %s4599_s3 }
  0x60   : > { %p4602_p10 = pnand %p4600_p8, %p5238_p5  ;;  %p4607_p2 = por %p4606_p13, %p4605_p1 }
  0x62   : > { %p4603_p12 = pneg %p4602_p10 }
  0x64   : > { %p4608_p3 = pnand %p4607_p2, %p4603_p12 }
  0x66   : > { %4611 = shalt.err (!%p4608_p3)
}
  0x67   : > { %s4612_s16 = scalar_lea.vmem %s738_s9, 48  ;;  %s4985_s20 = smov [#allocation13]  }
  0x68   : > { %p4613_p6 = scmp.ne.s32.totalorder %s738_s9, %s4612_s16  ;;  %s4617_s25 = sshll.u32 %s4985_s20, 4  ;;  %s4618_s25 = int_to_ptr.vmem [resolvable:$false] %s4617_s25 }
  0x69   : > { %s4619_s17 = scalar_lea.vmem %s4618_s25, 96  ;;  %p4620_p4 = scmp.lt.s32.totalorder %s738_s9, %s4618_s25 }
  0x6a   : > { %p4615_p7 = pnand %p4613_p6, %p5238_p5  ;;  %p4621_p9 = scmp.lt.s32.totalorder %s4619_s17, %s4612_s16 }
  0x6c   : > { %p4616_p11 = pneg %p4615_p7  ;;  %p4622_p8 = por %p4621_p9, %p4620_p4 }
  0x6e   : > { %p4623_p10 = pnand %p4622_p8, %p4616_p11 }
  0x70   : > { %4626 = shalt.err (!%p4623_p10)
}
  0x71   : > { %4255 = dma.hbm_to_vmem [thread:$0]  (!%p5202_p0), %s735_s30, 48, %s738_s9, %s5232_s28  }
  0x72   : > { %s3754_s14 = sshll.u32 %s5198_s24, 6  ;;  %s3929_s18 = sshll.u32 %s4977_s1, 10 }
  0x73   : > { %s5980_s21 = sld [smem:[#allocation41_spill]]  ;;  %s748_s5 = scalar_lea.vmem [#allocation14], %s3754_s14 }
  0x74   : > { %s755_s26 = sshll.u32 %s748_s5, 4  ;;  %s5290_s3 = sshll.u32 %s4977_s1, 4  ;;  %s5287_s26 = int_to_ptr.vmem [resolvable:$true] %s755_s26 }
  0x79   : > { %s5285_s22 = scalar_lea.hbm %s5980_s21, %s3929_s18  ;;  %s4632_s16 = scalar_lea.hbm %s5980_s21, 4096 }
  0x7a   : > { %s4627_s8 = scalar_lea.hbm %s5285_s22, 1024  ;;  %p4633_p2 = scmp.lt.s32.totalorder %s5285_s22, %s5980_s21 }
  0x7b   : > { %p4628_p12 = scmp.ne.s32.totalorder %s5285_s22, %s4627_s8  ;;  %p4634_p3 = scmp.lt.s32.totalorder %s4632_s16, %s4627_s8 }
  0x7d   : > { %p4630_p1 = pnand %p4628_p12, %p5238_p5  ;;  %p4635_p6 = por %p4634_p3, %p4633_p2 }
  0x7f   : > { %p4631_p13 = pneg %p4630_p1 }
  0x81   : > { %p4636_p7 = pnand %p4635_p6, %p4631_p13 }
  0x83   : > { %4639 = shalt.err (!%p4636_p7)
}
  0x84   : > { %s4640_s17 = scalar_lea.vmem %s5287_s26, 1024  ;;  %s4986_s14 = smov [#allocation14]  }
  0x85   : > { %p4641_p11 = scmp.ne.s32.totalorder %s5287_s26, %s4640_s17  ;;  %s4645_s18 = sshll.u32 %s4986_s14, 4  ;;  %s4646_s18 = int_to_ptr.vmem [resolvable:$false] %s4645_s18 }
  0x86   : > { %s4647_s27 = scalar_lea.vmem %s4646_s18, 2048  ;;  %p4648_p8 = scmp.lt.s32.totalorder %s5287_s26, %s4646_s18 }
  0x87   : > { %p4643_p4 = pnand %p4641_p11, %p5238_p5  ;;  %p4649_p10 = scmp.lt.s32.totalorder %s4647_s27, %s4640_s17 }
  0x89   : > { %p4644_p9 = pneg %p4643_p4  ;;  %p4650_p12 = por %p4649_p10, %p4648_p8 }
  0x8b   : > { %p4651_p1 = pnand %p4650_p12, %p4644_p9 }
  0x8d   : > { %4654 = shalt.err (!%p4651_p1)
}
  0x8e   : > { %s5944_s7 = smov 64   ;;  %s4988_s5 = smov 4  }
  0x8f   : > { %4258 = dma.hbm_to_vmem [thread:$0]  (!%p5202_p0), %s5285_s22, 1024, %s5287_s26, %s5232_s28, %s5944_s7, %s5944_s7, %s4988_s5  }
  0x90   : > { %s5981_s10 = sld [smem:[#allocation44_spill]]  ;;  %s780_s16 = scalar_lea.vmem [#allocation15], %s5198_s24 }
  0x91   : > { %s787_s20 = sshll.u32 %s780_s16, 4  ;;  %s788_s20 = int_to_ptr.vmem [resolvable:$true] %s787_s20 }
  0x96   : > { %s785_s30 = scalar_lea.hbm %s5981_s10, %s5290_s3  ;;  %s4660_s18 = scalar_lea.hbm %s5981_s10, 64 }
  0x97   : > { %s4655_s25 = scalar_lea.hbm %s785_s30, 16  ;;  %p4661_p6 = scmp.lt.s32.totalorder %s785_s30, %s5981_s10 }
  0x98   : > { %p4656_p13 = scmp.ne.s32.totalorder %s785_s30, %s4655_s25  ;;  %p4662_p7 = scmp.lt.s32.totalorder %s4660_s18, %s4655_s25 }
  0x9a   : > { %p4658_p2 = pnand %p4656_p13, %p5238_p5  ;;  %p4663_p11 = por %p4662_p7, %p4661_p6 }
  0x9c   : > { %p4659_p3 = pneg %p4658_p2 }
  0x9e   : > { %p4664_p4 = pnand %p4663_p11, %p4659_p3 }
  0xa0   : > { %4667 = shalt.err (!%p4664_p4)
}
  0xa1   : > { %s4668_s22 = scalar_lea.vmem %s788_s20, 16  ;;  %s4989_s26 = smov [#allocation15]  }
  0xa2   : > { %p4669_p9 = scmp.ne.s32.totalorder %s788_s20, %s4668_s22  ;;  %s4673_s8 = sshll.u32 %s4989_s26, 4  ;;  %s4674_s8 = int_to_ptr.vmem [resolvable:$false] %s4673_s8 }
  0xa3   : > { %s4675_s9 = scalar_lea.vmem %s4674_s8, 32  ;;  %p4676_p12 = scmp.lt.s32.totalorder %s788_s20, %s4674_s8 }
  0xa4   : > { %p4671_p8 = pnand %p4669_p9, %p5238_p5  ;;  %p4677_p1 = scmp.lt.s32.totalorder %s4675_s9, %s4668_s22 }
  0xa6   : > { %p4672_p10 = pneg %p4671_p8  ;;  %p4678_p13 = por %p4677_p1, %p4676_p12 }
  0xa8   : > { %p4679_p2 = pnand %p4678_p13, %p4672_p10 }
  0xaa   : > { %4682 = shalt.err (!%p4679_p2)
}
  0xab   : > { %4261 = dma.hbm_to_vmem [thread:$0]  (!%p5202_p0), %s785_s30, 16, %s788_s20, %s5232_s28  }
  0xac   : > { %s802_s25 = scalar_lea.hbm %s5906_s11, %s5290_s3  ;;  %s797_s17 = scalar_lea.vmem [#allocation16], %s5198_s24 }
  0xad   : > { %s804_s14 = sshll.u32 %s797_s17, 4  ;;  %s4683_s18 = scalar_lea.hbm %s802_s25, 16  ;;  %s805_s14 = int_to_ptr.vmem [resolvable:$true] %s804_s14 }
  0xae   : > { %p4684_p3 = scmp.ne.s32.totalorder %s802_s25, %s4683_s18  ;;  %s4688_s26 = scalar_lea.hbm %s5906_s11, 64 }
  0xaf   : > { %p4689_p11 = scmp.lt.s32.totalorder %s802_s25, %s5906_s11  ;;  %p4690_p4 = scmp.lt.s32.totalorder %s4688_s26, %s4683_s18 }
  0xb0   : > { %p4686_p6 = pnand %p4684_p3, %p5238_p5 }
  0xb1   : > { %p4691_p9 = por %p4690_p4, %p4689_p11 }
  0xb2   : > { %p4687_p7 = pneg %p4686_p6 }
  0xb4   : > { %p4692_p8 = pnand %p4691_p9, %p4687_p7 }
  0xb6   : > { %4695 = shalt.err (!%p4692_p8)
}
  0xb7   : > { %s4696_s30 = scalar_lea.vmem %s805_s14, 16  ;;  %s4990_s20 = smov [#allocation16]  }
  0xb8   : > { %p4697_p10 = scmp.ne.s32.totalorder %s805_s14, %s4696_s30  ;;  %s4701_s0 = sshll.u32 %s4990_s20, 4  ;;  %s4702_s0 = int_to_ptr.vmem [resolvable:$false] %s4701_s0 }
  0xb9   : > { %s4703_s16 = scalar_lea.vmem %s4702_s0, 32  ;;  %p4704_p13 = scmp.lt.s32.totalorder %s805_s14, %s4702_s0 }
  0xba   : > { %p4699_p12 = pnand %p4697_p10, %p5238_p5  ;;  %p4705_p2 = scmp.lt.s32.totalorder %s4703_s16, %s4696_s30 }
  0xbc   : > { %p4700_p1 = pneg %p4699_p12  ;;  %p4706_p3 = por %p4705_p2, %p4704_p13 }
  0xbe   : > { %p4707_p6 = pnand %p4706_p3, %p4700_p1 }
  0xc0   : > { %4710 = shalt.err (!%p4707_p6)
}
  0xc1   : > { %4264 = dma.hbm_to_vmem [thread:$0]  (!%p5202_p0), %s802_s25, 16, %s805_s14, %s5232_s28  }
  0xc2   : > { %s4991_s17 = smov [#allocation7]   ;;  %s5356_s26 = scalar_lea.hbm %s5907_s12, %s5290_s3 }
  0xc3   : > { %s633_s18 = sshll.u32 %s4991_s17, 4  ;;  %p5982_p11 = scmp.ne.s32.totalorder %s5975_s6, 0  ;;  %s634_s18 = int_to_ptr.vmem [resolvable:$true] %s633_s18 }
  0xc4   : > { %s4722_s8 = scalar_lea.vmem %s634_s18, 256  ;;  %p4730_p8 = scmp.lt.s32.totalorder %s634_s18, %s634_s18 }
  0xc5   : > { %p4723_p7 = scmp.ne.s32.totalorder %s634_s18, %s4722_s8  ;;  %p4731_p10 = scmp.lt.s32.totalorder %s4722_s8, %s4722_s8 }
  0xc7   : > { %p4725_p4 = pnand %p4723_p7, %p5982_p11  ;;  %p4732_p12 = por %p4731_p10, %p4730_p8 }
  0xc9   : > { %p4726_p9 = pneg %p4725_p4 }
  0xcb   : > { %p4733_p1 = pnand %p4732_p12, %p4726_p9 }
  0xcd   : > { %4736 = shalt.err (!%p4733_p1)
}
  0xce   : > { %p5983_p13 = scmp.ne.s32.totalorder %s5973_s4, 0  ;;  %s5984_s25 = smov 8  }
  0xcf   : > { %s5985_s14 = smov 128   ;;  %s5986_s20 = sld [smem:[#allocation35_spill]] }
  0xd0   : > { %s814_s3 = scalar_lea.vmem [#allocation17], %s5198_s24  ;;  %s4992_s16 = smov [#allocation9]  }
  0xd1   : > { %s821_s0 = sshll.u32 %s814_s3, 4  ;;  %s646_s17 = sshll.u32 %s4992_s16, 4  ;;  %s822_s0 = int_to_ptr.vmem [resolvable:$true] %s821_s0  ;;  %s647_s17 = int_to_ptr.vmem [resolvable:$true] %s646_s17 }
  0xd2   : > { %s4737_s27 = scalar_lea.hbm %s5356_s26, 16  ;;  %s4742_s9 = scalar_lea.hbm %s5907_s12, 64 }
  0xd3   : > { %p4738_p2 = scmp.ne.s32.totalorder %s5356_s26, %s4737_s27  ;;  %p4743_p7 = scmp.lt.s32.totalorder %s5356_s26, %s5907_s12 }
  0xd4   : > { %p4744_p4 = scmp.lt.s32.totalorder %s4742_s9, %s4737_s27 }
  0xd5   : > { %4239 = dma.hbm_to_vmem [thread:$0]  (!%p5983_p13), %s5986_s20, 256, %s634_s18, [#allocation8], %s5985_s14, %s5985_s14, %s5984_s25  }
  0xd6   : > { %p4740_p3 = pnand %p4738_p2, %p5238_p5  ;;  %p4745_p9 = por %p4744_p4, %p4743_p7 }
  0xd8   : > { %p4741_p6 = pneg %p4740_p3 }
  0xda   : > { %p4746_p8 = pnand %p4745_p9, %p4741_p6 }
  0xdc   : > { %4749 = shalt.err (!%p4746_p8)
}
  0xdd   : > { %s4750_s18 = scalar_lea.vmem %s822_s0, 16  ;;  %s4993_s20 = smov [#allocation17]  }
  0xde   : > { %p4751_p10 = scmp.ne.s32.totalorder %s822_s0, %s4750_s18  ;;  %s4755_s3 = sshll.u32 %s4993_s20, 4  ;;  %s4756_s3 = int_to_ptr.vmem [resolvable:$false] %s4755_s3 }
  0xdf   : > { %s4757_s16 = scalar_lea.vmem %s4756_s3, 32  ;;  %p4758_p2 = scmp.lt.s32.totalorder %s822_s0, %s4756_s3 }
  0xe0   : > { %p4753_p12 = pnand %p4751_p10, %p5238_p5  ;;  %p4759_p3 = scmp.lt.s32.totalorder %s4757_s16, %s4750_s18 }
  0xe2   : > { %p4754_p1 = pneg %p4753_p12  ;;  %p4760_p13 = por %p4759_p3, %p4758_p2 }
  0xe4   : > { %p4761_p11 = pnand %p4760_p13, %p4754_p1 }
  0xe6   : > { %4764 = shalt.err (!%p4761_p11)
}
  0xe7   : > { %4267 = dma.hbm_to_vmem [thread:$0]  (!%p5202_p0), %s5356_s26, 16, %s822_s0, %s5232_s28  }
  0xe8   : > { %s3760_s7 = sshll.u32 %s5198_s24, 8  ;;  %s4776_s27 = scalar_lea.vmem %s647_s17, 256 }
  0xe9   : > { %p4777_p6 = scmp.ne.s32.totalorder %s647_s17, %s4776_s27  ;;  %p5987_p7 = scmp.ne.s32.totalorder %s5975_s6, 0 }
  0xea   : > { %p4784_p8 = scmp.lt.s32.totalorder %s647_s17, %s647_s17  ;;  %p4785_p10 = scmp.lt.s32.totalorder %s4776_s27, %s4776_s27 }
  0xeb   : > { %p4779_p4 = pnand %p4777_p6, %p5987_p7 }
  0xec   : > { %p4786_p12 = por %p4785_p10, %p4784_p8 }
  0xed   : > { %p4780_p9 = pneg %p4779_p4 }
  0xef   : > { %p4787_p2 = pnand %p4786_p12, %p4780_p9 }
  0xf1   : > { %4790 = shalt.err (!%p4787_p2)
}
  0xf2   : > { %p5988_p11 = scmp.ne.s32.totalorder %s5973_s4, 0  ;;  %s5989_s26 = sld [smem:[#allocation36_spill]] }
  0xf3   : > { %s3930_s0 = sshll.u32 %s4977_s1, 12  ;;  %s832_s20 = scalar_lea.vmem [#allocation18], %s3760_s7 }
  0xf4   : > { %s5403_s18 = scalar_lea.hbm %s5908_s13, %s3930_s0  ;;  %s839_s3 = sshll.u32 %s832_s20, 4  ;;  %s5407_s3 = int_to_ptr.vmem [resolvable:$true] %s839_s3 }
  0xf5   : > { %s4791_s16 = scalar_lea.hbm %s5403_s18, 4096  ;;  %p4797_p6 = scmp.lt.s32.totalorder %s5403_s18, %s5908_s13 }
  0xf6   : > { %p4792_p13 = scmp.ne.s32.totalorder %s5403_s18, %s4791_s16 }
  0xf8   : > { %4242 = dma.hbm_to_vmem [thread:$0]  (!%p5988_p11), %s5989_s26, 256, %s647_s17, [#allocation8], %s5985_s14, %s5985_s14, %s5984_s25  }
  0xf9   : > { %p4794_p1 = pnand %p4792_p13, %p5238_p5  ;;  %s4796_s17 = scalar_lea.hbm %s5908_s13, 16384 }
  0xfa   : > { %p4798_p4 = scmp.lt.s32.totalorder %s4796_s17, %s4791_s16 }
  0xfb   : > { %p4795_p3 = pneg %p4794_p1 }
  0xfc   : > { %p4799_p9 = por %p4798_p4, %p4797_p6 }
  0xfe   : > { %p4800_p8 = pnand %p4799_p9, %p4795_p3 }
 0x100   : > { %4803 = shalt.err (!%p4800_p8)
}
 0x101   : > { %s4804_s8 = scalar_lea.vmem %s5407_s3, 4096  ;;  %s4994_s26 = smov [#allocation18]  }
 0x102   : > { %p4805_p10 = scmp.ne.s32.totalorder %s5407_s3, %s4804_s8  ;;  %s4809_s9 = sshll.u32 %s4994_s26, 4  ;;  %s4810_s9 = int_to_ptr.vmem [resolvable:$false] %s4809_s9 }
 0x103   : > { %s4811_s30 = scalar_lea.vmem %s4810_s9, 8192  ;;  %p4812_p13 = scmp.lt.s32.totalorder %s5407_s3, %s4810_s9 }
 0x104   : > { %p4807_p12 = pnand %p4805_p10, %p5238_p5  ;;  %p4813_p1 = scmp.lt.s32.totalorder %s4811_s30, %s4804_s8 }
 0x106   : > { %p4808_p2 = pneg %p4807_p12  ;;  %p4814_p11 = por %p4813_p1, %p4812_p13 }
 0x108   : > { %p4815_p7 = pnand %p4814_p11, %p4808_p2 }
 0x10a   : > { %4818 = shalt.err (!%p4815_p7)
}
 0x10b   : > { %s4995_s20 = smov 256   ;;  %s4996_s16 = smov 16  }
 0x10c   : > { %4270 = dma.hbm_to_vmem [thread:$0]  (!%p5202_p0), %s5403_s18, 4096, %s5407_s3, %s5232_s28, %s4995_s20, %s4995_s20, %s4996_s16  }
 0x10d   : > { %s4997_s25 = smov [#allocation10]   ;;  %s4998_s17 = smov [#allocation20]  }
 0x10e   : > { %s659_s14 = sshll.u32 %s4997_s25, 4  ;;  %s681_s27 = sshll.u32 %s4998_s17, 4  ;;  %s660_s14 = int_to_ptr.vmem [resolvable:$true] %s659_s14  ;;  %s682_s27 = int_to_ptr.vmem [resolvable:$true] %s681_s27 }
 0x10f   : > { %s4830_s22 = scalar_lea.vmem %s660_s14, 1024  ;;  %p5990_p6 = scmp.ne.s32.totalorder %s5975_s6, 0 }
 0x110   : > { %p4831_p3 = scmp.ne.s32.totalorder %s660_s14, %s4830_s22  ;;  %p4838_p7 = scmp.lt.s32.totalorder %s660_s14, %s660_s14 }
 0x111   : > { %p4839_p9 = scmp.lt.s32.totalorder %s4830_s22, %s4830_s22 }
 0x112   : > { %p4833_p4 = pnand %p4831_p3, %p5990_p6 }
 0x113   : > { %p4840_p8 = por %p4839_p9, %p4838_p7 }
 0x114   : > { %p4834_p11 = pneg %p4833_p4 }
 0x116   : > { %p4841_p10 = pnand %p4840_p8, %p4834_p11 }
 0x118   : > { %4844 = shalt.err (!%p4841_p10)
}
 0x119   : > { %p5991_p12 = scmp.ne.s32.totalorder %s5973_s4, 0  ;;  %s5992_s8 = smov 64  }
 0x11a   : > { %s5993_s26 = sld [smem:[#allocation37_spill]]  ;;  %s4856_s9 = scalar_lea.vmem %s682_s27, 1024 }
 0x11b   : > { %p4857_p2 = scmp.ne.s32.totalorder %s682_s27, %s4856_s9  ;;  %p4864_p3 = scmp.lt.s32.totalorder %s682_s27, %s682_s27 }
 0x11c   : > { %p4865_p4 = scmp.lt.s32.totalorder %s4856_s9, %s4856_s9 }
 0x11d   : > { %p4859_p13 = pnand %p4857_p2, %p5990_p6 }
 0x11e   : > { %p4866_p11 = por %p4865_p4, %p4864_p3 }
 0x11f   : > { %p4860_p1 = pneg %p4859_p13 }
 0x120   : > { %4245 = dma.hbm_to_vmem [thread:$0]  (!%p5991_p12), %s5993_s26, 1024, %s660_s14, [#allocation11], %s5992_s8, %s5992_s8, %s4988_s5  }
 0x121   : > { %p4867_p7 = pnand %p4866_p11, %p4860_p1 }
 0x123   : > { %4870 = shalt.err (!%p4867_p7)
}
 0x124   : > { %4248 = dma.hbm_to_vmem [thread:$0]  (!%p5991_p12), %s5914_s19, 1024, %s682_s27, [#allocation8], %s5992_s8, %s5992_s8, %s4988_s5  }
 0x125   : > { %s5455_s25 = scalar_lea.hbm %s5910_s15, %s3930_s0  ;;  %s860_s4 = scalar_lea.vmem [#allocation19], %s3760_s7 }
 0x126   : > { %s867_s14 = sshll.u32 %s860_s4, 4  ;;  %s4871_s17 = scalar_lea.hbm %s5455_s25, 4096  ;;  %s868_s14 = int_to_ptr.vmem [resolvable:$true] %s867_s14 }
 0x127   : > { %p4872_p6 = scmp.ne.s32.totalorder %s5455_s25, %s4871_s17  ;;  %s4876_s1 = scalar_lea.hbm %s5910_s15, 16384 }
 0x128   : > { %p4877_p10 = scmp.lt.s32.totalorder %s5455_s25, %s5910_s15  ;;  %p4878_p12 = scmp.lt.s32.totalorder %s4876_s1, %s4871_s17 }
 0x129   : > { %p4874_p9 = pnand %p4872_p6, %p5238_p5 }
 0x12a   : > { %p4879_p2 = por %p4878_p12, %p4877_p10 }
 0x12b   : > { %p4875_p8 = pneg %p4874_p9 }
 0x12d   : > { %p4880_p13 = pnand %p4879_p2, %p4875_p8 }
 0x12f   : > { %4883 = shalt.err (!%p4880_p13)
}
 0x130   : > { %s4884_s24 = scalar_lea.vmem %s868_s14, 4096  ;;  %s4999_s7 = smov [#allocation19]  }
 0x131   : > { %p4885_p1 = scmp.ne.s32.totalorder %s868_s14, %s4884_s24  ;;  %s4889_s0 = sshll.u32 %s4999_s7, 4  ;;  %s4890_s0 = int_to_ptr.vmem [resolvable:$false] %s4889_s0 }
 0x132   : > { %s4891_s26 = scalar_lea.vmem %s4890_s0, 8192  ;;  %p4892_p11 = scmp.lt.s32.totalorder %s868_s14, %s4890_s0 }
 0x133   : > { %p4887_p3 = pnand %p4885_p1, %p5238_p5  ;;  %p4893_p7 = scmp.lt.s32.totalorder %s4891_s26, %s4884_s24 }
 0x135   : > { %p4888_p4 = pneg %p4887_p3  ;;  %p4894_p6 = por %p4893_p7, %p4892_p11 }
 0x137   : > { %p4895_p9 = pnand %p4894_p6, %p4888_p4 }
 0x139   : > { %4898 = shalt.err (!%p4895_p9)
}
 0x13a   : > { %4273 = dma.hbm_to_vmem [thread:$0]  (!%p5202_p0), %s5455_s25, 4096, %s868_s14, %s5232_s28, %s5992_s8, %s5992_s8, %s4988_s5  }
 0x13b   : > { %p5994_p5 = scmp.ne.s32.totalorder %s5972_s29, 0 }
 0x13c   : > { %s5995_s23 = sld [smem:[#allocation30_spill]] (!%p5994_p5) }
 0x13d   : > { %885 = sbr.rel (%p5994_p5) target bundleno = 3796 (0xed4), region = 112 }
 0x142   : > { %p5996_p8 = scmp.eq.s32.totalorder %s5995_s23, 0 }
 0x144   : > { %4940 = dma.done.wait (%p5996_p8), [#allocation5], 256   ;;  %p5997_p10 = pmov %p5996_p8 }
 0x145   : > { %p5998_p12 = pmov %p5996_p8 }
 0x146   : > { %4942 = vsyncadd (%p5997_p10), [#allocation5], 4294967040 }
 0x147   : > { %4944 = dma.done.wait (%p5998_p12), [#allocation8], 512   ;;  %p5999_p2 = pmov %p5996_p8 }
 0x149   : > { %4946 = vsyncadd (%p5999_p2), [#allocation8], 4294966784  ;;  %p6000_p13 = pmov %p5999_p2 }
 0x14a   : > { %p6001_p0 = pmov %p5999_p2 }
 0x14b   : > { %4948 = dma.done.wait (%p6000_p13), [#allocation11], 1024  }
 0x14c   : > { %4950 = vsyncadd (%p6001_p0), [#allocation11], 4294966272  ;;  %s6002_s28 = sld [smem:[#allocation28_spill]]  ;;  %s903_s2 = sand.u32 1, %s5995_s23  }
 0x14d   : > { %s6003_s29 = sld [smem:[#allocation33_spill]]  ;;  %s904_s9 = scalar_lea.sflag [#allocation5], %s903_s2 }
 0x152   : > { %s5495_s5 = sand.u32 1, %s6002_s28  }
 0x153   : > { %s4191_s8 = smul.u32 192, %s5495_s5  ;;  %p6004_p1 = scmp.ne.s32.totalorder %s6003_s29, 0 }
 0x155   : > { %s5498_s30 = scalar_lea.vmem [#allocation12], %s4191_s8 }
 0x156   : > { %4952 = dma.done.wait (%p6004_p1), %s904_s9, 12384  }
 0x157   : > { %4954 = vsyncadd (%p6004_p1), %s904_s9, 4294954912  ;;  %s4192_s20 = smul.u32 3, %s5495_s5  ;;  %s3771_s6 = sshll.u32 %s5495_s5, 6 }
 0x158   : > { %s3772_s16 = sshll.u32 %s5495_s5, 8  ;;  %s5509_s4 = scalar_lea.vmem [#allocation14], %s3771_s6 }
 0x159   : > { %s5507_s25 = scalar_lea.vmem [#allocation13], %s4192_s20  ;;  %s5514_s27 = scalar_lea.vmem [#allocation18], %s3772_s16 }
 0x15a   : > { %s5516_s1 = scalar_lea.vmem [#allocation19], %s3772_s16  ;;  %p6005_p3 = pmov %p6001_p0 }
 0x15b   : > { %p6006_p4 = pmov %p6001_p0 }
 0x15c   : > { %4956 = dma.done.wait (%p6005_p3), [#allocation8], 1024  }
 0x15d   : > { %4958 = vsyncadd (%p6006_p4), [#allocation8], 4294966272  ;;  %p1074_p11 = scmp.lt.s32.totalorder %s5995_s23, 3  ;;  %s6007_s7 = sld [smem:[#allocation42_spill]] }
 0x15e   : > { %s6008_s29 = sld [smem:[#allocation43_spill]]  ;;  %p6011_p7 = scmp.ne.s32.totalorder %s5995_s23, 0 }
 0x15f   : > { %s5524_s18 = scalar_select %p1074_p11, %s5995_s23, 3 }
 0x160   : > { %s6009_s6 = sld [smem:[#allocation46_spill]] }
 0x161   : > { %s3775_s8 = sshll.u32 %s5524_s18, 2  ;;  %s6010_s14 = sld [smem:[#allocation45_spill]] }
 0x162   : > { %s6012_s17 = sld [smem:[#allocation38_spill]] (!%p6011_p7) }
 0x163   : > { %s1076_s0 = scalar_lea.vmem %s6007_s7, %s5524_s18  ;;  %1091 = sbr.rel (%p6011_p7) target bundleno = 595 (0x253), region = 168 }
 0x164   : > { %s1079_s2 = scalar_lea.vmem %s6008_s29, %s5524_s18 }
 0x166   : > { %s1086_s16 = scalar_lea.vmem %s6009_s6, %s5524_s18 }
 0x167   : > { %s5542_s10 = scalar_lea.vmem %s6010_s14, %s3775_s8 }
 0x168   : > { %v4344_v1 = vld [vmem:[#allocation10 + $0x38] sm:$0xff]   ;;  %v5000_v2 = vmov 0.0   ;;  %v4345_v3 = vld [vmem:[#allocation10 + $0x30] sm:$0xff]   ;;  %vm5001_vm0 = vmmov 0   ;;  %v4346_v4 = vld [vmem:[#allocation10 + $0x28] sm:$0xff]  }
 0x169   : > { %4046 = vmatprep.subr.bf16.mxu0 %v5000_v2  ;;  %4062 = vmatprep.mubr.msk.bf16.mxu0 %vm5001_vm0, %v5000_v2  ;;  %v4347_v5 = vld [vmem:[#allocation10 + $0x20] sm:$0xff]   ;;  %v4348_v6 = vld [vmem:[#allocation10 + $0x18] sm:$0xff]   ;;  %v4349_v7 = vld [vmem:[#allocation10 + $0x10] sm:$0xff]  }
 0x16a   : > { %4047 = vmatpush3.bf16.msra.mxu0 %v4344_v1  ;;  %v4350_v8 = vld [vmem:[#allocation10 + $0x8] sm:$0xff]   ;;  %v4351_v9 = vld [vmem:[#allocation10] sm:$0xff]   ;;  %v1092_v10 = vld [vmem:[#allocation4] sm:$0xff] }
 0x16b   : > { %4048 = vmatprep.subr.bf16.mxu0 %v5000_v2  ;;  %v1093_v11 = vld [vmem:[#allocation4 + $0x8] sm:$0xff]  ;;  %v1207_v15 = vld [vmem:[#allocation7] sm:$0xff]  ;;  %v1208_v20 = vld [vmem:[#allocation7 + $0x8] sm:$0xff] }
 0x16c   : > { %v1094_v12 = vpack.c.bf16 %v1093_v11, %v1092_v10  ;;  %v3777_v13 = vld [vmem:[%s6012_s17] ss:$0 sm:$0xff] }
 0x16e   : > { %4049 = vmatpush3.bf16.msra.mxu0 %v4345_v3 }
 0x16f   : > { %4050 = vmatprep.subr.bf16.mxu0 %v5000_v2 }
 0x172   : > { %4051 = vmatpush3.bf16.msra.mxu0 %v4346_v4 }
 0x173   : > { %4052 = vmatprep.subr.bf16.mxu0 %v5000_v2 }
 0x176   : > { %4053 = vmatpush3.bf16.msra.mxu0 %v4347_v5 }
 0x177   : > { %4054 = vmatprep.subr.bf16.mxu0 %v5000_v2 }
 0x17a   : > { %4055 = vmatpush3.bf16.msra.mxu0 %v4348_v6 }
 0x17b   : > { %4056 = vmatprep.subr.bf16.mxu0 %v5000_v2 }
 0x17e   : > { %4057 = vmatpush3.bf16.msra.mxu0 %v4349_v7 }
 0x17f   : > { %4058 = vmatprep.subr.bf16.mxu0 %v5000_v2 }
 0x182   : > { %4059 = vmatpush3.bf16.msra.mxu0 %v4350_v8 }
 0x183   : > { %4060 = vmatprep.subr.bf16.mxu0 %v5000_v2 }
 0x186   : > { %4061 = vmatpush3.bf16.msra.mxu0 %v4351_v9 }
 0x189   : > { %4063 = vmatmul.mubr.bf16.vlgmr.msra.gmra.mxu0 %v1094_v12 }
 0x249   : > { %v1200_v14 = vpop.f32.mrf.mxu0 }
 0x24a   : > { %v1201_v16 = vadd.f32 %v3777_v13, %v1200_v14 }
 0x24b   : > { %v4064_v17 = vpop.f32.mrf.mxu0 }
 0x24c   : > { %v1209_v18 = vadd.f32 %v1207_v15, %v1201_v16 }
 0x24d   : > { %v1203_v19 = vpop.f32.mrf.mxu0 }
 0x24e   : > { %1211 = vst [vmem:[#allocation2] sm:$0xff] %v1209_v18  ;;  %v1204_v21 = vadd.f32 %v3777_v13, %v1203_v19 }
 0x24f   : > { %v4065_v22 = vpop.f32.mrf.mxu0 }
 0x250   : > { %v1210_v23 = vadd.f32 %v1208_v20, %v1204_v21 }
 0x252   : > { %1212 = vst [vmem:[#allocation2 + $0x8] sm:$0xff] %v1210_v23 }
 0x253 PF: > { %v4367_v24 = vld [vmem:[%s5498_s30 + $0xac] ss:$12 sps:$4 sm:$0xff]   ;;  %v4369_v25 = vld [vmem:[%s5498_s30 + $0xa8] ss:$12 sps:$4 sm:$0xff]   ;;  %v5002_v26 = vmov 0   ;;  %v5003_v27 = vmov 0.0   ;;  %v1250_v53 = vlaneseq }
 0x254   : > { %1425 = vmatprep.mubr.bf16.mxu0 %v5002_v26  ;;  %4066 = vmatprep.subr.bf16.mxu1 %v5003_v27  ;;  %v4370_v28 = vld [vmem:[%s5498_s30 + $0x94] ss:$12 sps:$4 sm:$0xff]   ;;  %v4372_v29 = vld [vmem:[%s5498_s30 + $0x90] ss:$12 sps:$4 sm:$0xff]   ;;  %v4375_v31 = vld [vmem:[%s5498_s30 + $0x78] ss:$12 sps:$4 sm:$0xff]  }
 0x255   : > { %1393 = vmatprep.subr.bf16.mxu0 %v4367_v24  ;;  %v4373_v30 = vld [vmem:[%s5498_s30 + $0x7c] ss:$12 sps:$4 sm:$0xff]   ;;  %v4376_v32 = vld [vmem:[%s5498_s30 + $0x64] ss:$12 sps:$4 sm:$0xff]   ;;  %v4378_v33 = vld [vmem:[%s5498_s30 + $0x60] ss:$12 sps:$4 sm:$0xff]  }
 0x256   : > { %1394 = vmatpush1.bf16.msra.mxu0 %v4369_v25  ;;  %v4379_v34 = vld [vmem:[%s5498_s30 + $0x4c] ss:$12 sps:$4 sm:$0xff]   ;;  %v4391_v35 = vld [vmem:[%s5498_s30 + $0xb0] ss:$12 sps:$4 sm:$0xff]   ;;  %v4381_v37 = vld [vmem:[%s5498_s30 + $0x48] ss:$12 sps:$4 sm:$0xff]  }
 0x257   : > { %1395 = vmatprep.subr.bf16.mxu0 %v4370_v28  ;;  %4067 = vmatpush3.bf16.msra.mxu1 %v4391_v35  ;;  %v4392_v36 = vld [vmem:[%s5498_s30 + $0x98] ss:$12 sps:$4 sm:$0xff]   ;;  %v4382_v38 = vld [vmem:[%s5498_s30 + $0x34] ss:$12 sps:$4 sm:$0xff]   ;;  %v4384_v40 = vld [vmem:[%s5498_s30 + $0x30] ss:$12 sps:$4 sm:$0xff]  }
 0x258   : > { %4068 = vmatprep.subr.bf16.mxu1 %v5003_v27  ;;  %v4393_v39 = vld [vmem:[%s5498_s30 + $0x80] ss:$12 sps:$4 sm:$0xff]   ;;  %v4385_v41 = vld [vmem:[%s5498_s30 + $0x1c] ss:$12 sps:$4 sm:$0xff]   ;;  %v4387_v43 = vld [vmem:[%s5498_s30 + $0x18] ss:$12 sps:$4 sm:$0xff]  }
 0x259   : > { %v4394_v42 = vld [vmem:[%s5498_s30 + $0x68] ss:$12 sps:$4 sm:$0xff]   ;;  %v4388_v44 = vld [vmem:[%s5498_s30 + $0x4] ss:$12 sps:$4 sm:$0xff]   ;;  %v4390_v46 = vld [vmem:[%s5498_s30] ss:$12 sps:$4 sm:$0xff]  }
 0x25a   : > { %1396 = vmatpush1.bf16.msra.mxu0 %v4372_v29  ;;  %v4395_v45 = vld [vmem:[%s5498_s30 + $0x50] ss:$12 sps:$4 sm:$0xff]   ;;  %v5577_v48 = vld [vmem:[#allocation2 + $0x8] sm:$0xff]  ;;  %vm5004_vm1 = vmmov 0   ;;  %v5590_v54 = vshrl.u32 %v1250_v53, 7  ;;  %vm1525_vm2 = vcmask 261120  }
 0x25b   : > { %1397 = vmatprep.subr.bf16.mxu0 %v4373_v30  ;;  %4069 = vmatpush3.bf16.msra.mxu1 %v4392_v36  ;;  %v5575_v47 = vld [vmem:[#allocation2] sm:$0xff]  ;;  %v4398_v52 = vld [vmem:[%s5498_s30 + $0x8] ss:$12 sps:$4 sm:$0xff]   ;;  %s5007_s22 = smov 32   ;;  %vm1876_vm3 = vcmask 130048   ;;  %vm2315_vm4 = vcmask 523264  }
 0x25c   : > { %4070 = vmatprep.subr.bf16.mxu1 %v5003_v27  ;;  %v4396_v49 = vld [vmem:[%s5498_s30 + $0x38] ss:$12 sps:$4 sm:$0xff]   ;;  %v1215_v50 = vpack.c.bf16 %v5577_v48, %v5575_v47  ;;  %v4397_v51 = vld [vmem:[%s5498_s30 + $0x20] ss:$12 sps:$4 sm:$0xff]   ;;  %4082 = vmatprep.mubr.msk.bf16.mxu1 %vm5004_vm1, %v5003_v27  ;;  %v1252_v55 = vsub.s32 0, %v5590_v54  ;;  %v1256_v60 = vsub.s32 1, %v5590_v54 }
 0x25d   : > { %v1248_v56 = vld [vmem:[%s5507_s25] sm:$0x7]  ;;  %s5005_s30 = smov 96   ;;  %s5006_s25 = smov 64   ;;  %v1260_v4 = vsub.s32 2, %v5590_v54  ;;  %v1867_v25 = vld [vmem:[#allocation9 + $0x8] sm:$0xff] }
 0x25e   : > { %1398 = vmatpush1.bf16.msra.mxu0 %v4375_v31  ;;  %v1253_v57 = vrot.slane %v1248_v56, %v1252_v55  ;;  %v1257_v63 = vrot.slane %v1248_v56, %v1256_v60  ;;  %v1866_v30 = vld [vmem:[#allocation9] sm:$0xff]  ;;  %vm2318_vm5 = vcmask 785408   ;;  %s6015_s26 = scalar_lea.vmem [#allocation15], %s5495_s5  ;;  %s6017_s18 = scalar_lea.vmem [#allocation16], %s5495_s5 }
 0x25f   : > { %1399 = vmatprep.subr.bf16.mxu0 %v4376_v32  ;;  %4071 = vmatpush3.bf16.msra.mxu1 %v4393_v39  ;;  %v1261_v6 = vrot.slane %v1248_v56, %v1260_v4  ;;  %s6018_s29 = scalar_lea.vmem [#allocation17], %s5495_s5 }
 0x260   : > { %4072 = vmatprep.subr.bf16.mxu1 %v5003_v27 }
 0x262   : > { %1400 = vmatpush1.bf16.msra.mxu0 %v4378_v33 }
 0x263   : > { %1401 = vmatprep.subr.bf16.mxu0 %v4379_v34  ;;  %4073 = vmatpush3.bf16.msra.mxu1 %v4394_v42 }
 0x264   : > { %4074 = vmatprep.subr.bf16.mxu1 %v5003_v27 }
 0x266   : > { %1402 = vmatpush1.bf16.msra.mxu0 %v4381_v37 }
 0x267   : > { %1403 = vmatprep.subr.bf16.mxu0 %v4382_v38  ;;  %4075 = vmatpush3.bf16.msra.mxu1 %v4395_v45 }
 0x268   : > { %4076 = vmatprep.subr.bf16.mxu1 %v5003_v27 }
 0x26a   : > { %1404 = vmatpush1.bf16.msra.mxu0 %v4384_v40 }
 0x26b   : > { %1405 = vmatprep.subr.bf16.mxu0 %v4385_v41  ;;  %4077 = vmatpush3.bf16.msra.mxu1 %v4396_v49 }
 0x26c   : > { %4078 = vmatprep.subr.bf16.mxu1 %v5003_v27 }
 0x26e   : > { %1406 = vmatpush1.bf16.msra.mxu0 %v4387_v43 }
 0x26f   : > { %1407 = vmatprep.subr.bf16.mxu0 %v4388_v44  ;;  %4079 = vmatpush3.bf16.msra.mxu1 %v4397_v51 }
 0x270   : > { %4080 = vmatprep.subr.bf16.mxu1 %v5003_v27 }
 0x272   : > { %1408 = vmatpush1.bf16.msra.mxu0 %v4390_v46 }
 0x273   : > { %4081 = vmatpush3.bf16.msra.mxu1 %v4398_v52 }
 0x275   : > { %1426 = vmatmul.mubr.bf16.vlgmr.msra.gmra.mxu0 %v1215_v50 }
 0x276   : > { %4083 = vmatmul.mubr.bf16.vlgmr.msra.gmra.mxu1 %v1215_v50 }
 0x335   : > { %v1427_v58 = vpop.f32.mrf.mxu0 }
 0x336   : > { %v1428_v59 = vadd.f32 %v1427_v58, %v1253_v57  ;;  %v1470_v5 = vpop.f32.mrf.mxu1 }
 0x337   : > { %v1429_v61 = vpop.f32.mrf.mxu0  ;;  %v5620_v9 = vadd.f32 %v1470_v5, %v1261_v6 }
 0x338   : > { %1479 = vrot.lane.b32.xlu1 %v1428_v59, %s5005_s30  ;;  %4090 = vmatprep.mubr.msk.f32.mxu1 %vm1525_vm2, %v1428_v59  ;;  %v1430_v2 = vadd.f32 %v1429_v61, %v1257_v63  ;;  %v4084_v7 = vpop.f32.mrf.mxu1 }
 0x339   : > { %v1431_v62 = vpop.f32.mrf.mxu0 }
 0x33a   : > { %v1432_v3 = vadd.f32 %v1431_v62, %v1253_v57  ;;  %v1473_v8 = vpop.f32.mrf.mxu1 }
 0x33b   : > { %v1433_v0 = vpop.f32.mrf.mxu0  ;;  %v5622_v10 = vadd.f32 %v1473_v8, %v1261_v6 }
 0x33c   : > { %v1434_v1 = vadd.f32 %v1433_v0, %v1257_v63  ;;  %v4085_v11 = vpop.f32.mrf.mxu1 }
 0x33d   : > { %4114 = vmatprep.subr.mxu0 %v5622_v10 }
 0x33e   : > { %1495 = vrot.lane.b32.xlu0 %v1434_v1, %s5005_s30  ;;  %4086 = vmatprep.subr.msk.mxu1 %vm1525_vm2, %v1434_v1 }
 0x33f   : > { %1499 = vrot.lane.b32.xlu1 %v1434_v1, %s5006_s25  ;;  %4087 = vmatpush3.xpose.msk.msra.mxu1 %vm1525_vm2, %v1434_v1 }
 0x340   : > { %4088 = vmatprep.subr.msk.mxu1 %vm1525_vm2, %v1430_v2  ;;  %4115 = vmatpush3.msra.mxu0 %v5622_v10 }
 0x341   : > { %4116 = vmatprep.subr.mxu0 %v5620_v9 }
 0x342   : > { %1493 = vrot.lane.b32.xlu0 %v1430_v2, %s5005_s30  ;;  %4117 = vmatpush3.msra.mxu0 %v5620_v9 }
 0x343   : > { %1497 = vrot.lane.b32.xlu1 %v1430_v2, %s5006_s25  ;;  %4089 = vmatpush3.xpose.msk.msra.mxu1 %vm1525_vm2, %v1430_v2 }
 0x346   : > { %1481 = vrot.lane.b32.xlu0 %v1432_v3, %s5005_s30  ;;  %4091 = vmatmul.mubr.msk.f32.vlgmr.msra.gmra.mxu1 %vm1525_vm2, %v1432_v3 }
 0x347   : > { %1503 = vrot.lane.b32.xlu1 %v1434_v1, %s5007_s22 }
 0x34a   : > { %1483 = vrot.lane.b32.xlu0 %v1428_v59, %s5006_s25 }
 0x34b   : > { %1501 = vrot.lane.b32.xlu1 %v1430_v2, %s5007_s22 }
 0x34e   : > { %1485 = vrot.lane.b32.xlu0 %v1432_v3, %s5006_s25 }
 0x34f   : > { %1489 = vrot.lane.b32.xlu1 %v1432_v3, %s5007_s22 }
 0x352   : > { %1487 = vrot.lane.b32.xlu0 %v1428_v59, %s5007_s22 }
 0x3aa   : > { %v1480_v12 = vpop.permute.xlu1 %1479 }
 0x3ab   : > { %4097 = vmatprep.mubr.msk.f32.mxu1 %vm1525_vm2, %v1480_v12 }
 0x3b0   : > { %v1496_v13 = vpop.permute.xlu0 %1495 }
 0x3b1   : > { %v1500_v14 = vpop.permute.xlu1 %1499  ;;  %4093 = vmatprep.subr.msk.mxu1 %vm1525_vm2, %v1496_v13 }
 0x3b2   : > { %4094 = vmatpush3.xpose.msk.msra.mxu1 %vm1525_vm2, %v1496_v13 }
 0x3b4   : > { %v1494_v15 = vpop.permute.xlu0 %1493 }
 0x3b5   : > { %4095 = vmatprep.subr.msk.mxu1 %vm1525_vm2, %v1494_v15  ;;  %v1498_v16 = vpop.permute.xlu1 %1497 }
 0x3b6   : > { %4096 = vmatpush3.xpose.msk.msra.mxu1 %vm1525_vm2, %v1494_v15 }
 0x3b7   : > { %4100 = vmatprep.subr.msk.mxu1 %vm1525_vm2, %v1500_v14 }
 0x3b8   : > { %v1482_v17 = vpop.permute.xlu0 %1481 }
 0x3b9   : > { %4098 = vmatmul.mubr.msk.f32.vlgmr.msra.gmra.mxu1 %vm1525_vm2, %v1482_v17  ;;  %v1504_v18 = vpop.permute.xlu1 %1503 }
 0x3ba   : > { %4101 = vmatpush3.xpose.msk.msra.mxu1 %vm1525_vm2, %v1500_v14 }
 0x3bb   : > { %4102 = vmatprep.subr.msk.mxu1 %vm1525_vm2, %v1498_v16 }
 0x3bc   : > { %v1484_v19 = vpop.permute.xlu0 %1483 }
 0x3bd   : > { %4104 = vmatprep.mubr.msk.f32.mxu1 %vm1525_vm2, %v1484_v19  ;;  %v1502_v21 = vpop.permute.xlu1 %1501 }
 0x3be   : > { %4103 = vmatpush3.xpose.msk.msra.mxu1 %vm1525_vm2, %v1498_v16 }
 0x3bf   : > { %4107 = vmatprep.subr.msk.mxu1 %vm1525_vm2, %v1504_v18 }
 0x3c0   : > { %v1486_v20 = vpop.permute.xlu0 %1485 }
 0x3c1   : > { %4105 = vmatmul.mubr.msk.f32.vlgmr.msra.gmra.mxu1 %vm1525_vm2, %v1486_v20  ;;  %v1490_v23 = vpop.permute.xlu1 %1489 }
 0x3c2   : > { %4108 = vmatpush3.xpose.msk.msra.mxu1 %vm1525_vm2, %v1504_v18 }
 0x3c3   : > { %4109 = vmatprep.subr.msk.mxu1 %vm1525_vm2, %v1502_v21 }
 0x3c4   : > { %v1488_v22 = vpop.permute.xlu0 %1487 }
 0x3c5   : > { %4111 = vmatprep.mubr.msk.f32.mxu1 %vm1525_vm2, %v1488_v22 }
 0x3c6   : > { %4110 = vmatpush3.xpose.msk.msra.mxu1 %vm1525_vm2, %v1502_v21 }
 0x3c9   : > { %4112 = vmatmul.mubr.msk.f32.vlgmr.msra.gmra.mxu1 %vm1525_vm2, %v1490_v23 }
 0x406   : > { %v4092_v24 = vpop.f32.mrf.mxu1 }
 0x407   : > { %v1859_v28 = vmul.f32 0.17677669, %v4092_v24 }
 0x408   : > { %v1600_v29 = vpop.f32.mrf.mxu1 }
 0x409   : > { %v1858_v31 = vmul.f32 0.17677669, %v1600_v29  ;;  %v1869_v32 = vadd.f32 %v1867_v25, %v1859_v28 }
 0x40b   : > { %v1880_v33 = vsel %vm1876_vm3, %v1869_v32, -inf  ;;  %v1868_v34 = vadd.f32 %v1866_v30, %v1858_v31 }
 0x40c   : > { %1881 = vmax.xlane.f32.xlu1 %v1880_v33 }
 0x40d   : > { %v1877_v35 = vsel %vm1876_vm3, %v1868_v34, -inf }
 0x40e   : > { %1878 = vmax.xlane.f32.xlu0 %v1877_v35 }
 0x479   : > { %v4099_v36 = vpop.f32.mrf.mxu1 }
 0x47a   : > { %v1861_v37 = vmul.f32 0.17677669, %v4099_v36 }
 0x47b   : > { %v1683_v38 = vpop.f32.mrf.mxu1 }
 0x47c   : > { %v1860_v39 = vmul.f32 0.17677669, %v1683_v38  ;;  %v1871_v40 = vadd.f32 %v1867_v25, %v1861_v37 }
 0x47e   : > { %v1886_v41 = vsel %vm1876_vm3, %v1871_v40, -inf  ;;  %v1870_v42 = vadd.f32 %v1866_v30, %v1860_v39 }
 0x47f   : > { %1887 = vmax.xlane.f32.xlu0 %v1886_v41 }
 0x480   : > { %v1883_v45 = vsel %vm1876_vm3, %v1870_v42, -inf }
 0x481   : > { %v4106_v43 = vpop.f32.mrf.mxu1 }
 0x482   : > { %v1863_v44 = vmul.f32 0.17677669, %v4106_v43 }
 0x483   : > { %1884 = vmax.xlane.f32.xlu0 %v1883_v45  ;;  %v1766_v46 = vpop.f32.mrf.mxu1 }
 0x484   : > { %v1862_v49 = vmul.f32 0.17677669, %v1766_v46  ;;  %v1873_v50 = vadd.f32 %v1867_v25, %v1863_v44 }
 0x486   : > { %v1892_v51 = vsel %vm1876_vm3, %v1873_v50, -inf  ;;  %v1872_v52 = vadd.f32 %v1866_v30, %v1862_v49 }
 0x487   : > { %1893 = vmax.xlane.f32.xlu0 %v1892_v51 }
 0x488   : > { %v1889_v53 = vsel %vm1876_vm3, %v1872_v52, -inf }
 0x489   : > { %1890 = vmax.xlane.f32.xlu1 %v1889_v53  ;;  %v4113_v56 = vpop.f32.mrf.mxu1 }
 0x48a   : > { %v1865_v57 = vmul.f32 0.17677669, %v4113_v56 }
 0x48b   : > { %v1849_v58 = vpop.f32.mrf.mxu1 }
 0x48c   : > { %v1864_v59 = vmul.f32 0.17677669, %v1849_v58  ;;  %v1875_v61 = vadd.f32 %v1867_v25, %v1865_v57 }
 0x48e   : > { %v1898_v62 = vsel %vm1876_vm3, %v1875_v61, -inf  ;;  %v1874_v63 = vadd.f32 %v1866_v30, %v1864_v59 }
 0x48f   : > { %1899 = vmax.xlane.f32.xlu0 %v1898_v62 }
 0x490   : > { %v1895_v0 = vsel %vm1876_vm3, %v1874_v63, -inf }
 0x491   : > { %1896 = vmax.xlane.f32.xlu1 %v1895_v0 }
 0x495   : > { %v1882_v1 = vpop.xlane.xlu1 %1881 }
 0x496   : > { %v1902_v2 = vsub.f32 %v1869_v32, %v1882_v1 }
 0x497   : > { %v1879_v5 = vpop.xlane.xlu0 %1878 }
 0x498   : > { %v1911_v3 = vmul.f32 1.442695, %v1902_v2  ;;  %v1901_v6 = vsub.f32 %v1868_v34, %v1879_v5 }
 0x49a   : > { %4487 = vpow2.f32 %v1911_v3  ;;  %v1909_v7 = vmul.f32 1.442695, %v1901_v6 }
 0x49c   : > { %4489 = vpow2.f32 %v1909_v7 }
 0x4a2   : > { %1509 = vrot.lane.b32.xlu1 %v5622_v10, %s5005_s30 }
 0x4a5   : > { %1507 = vrot.lane.b32.xlu0 %v5620_v9, %s5005_s30 }
 0x4a6   : > { %1515 = vrot.lane.b32.xlu1 %v5622_v10, %s5006_s25 }
 0x4a7   : > { %v5662_v8 = vpop.eup %4487 }
 0x4a8   : > { %v1928_v11 = vsel %vm1876_vm3, %v5662_v8, 0.0 }
 0x4a9   : > { %v5666_v12 = vpop.eup %4489 }
 0x4aa   : > { %1521 = vrot.lane.b32.xlu1 %v5622_v10, %s5007_s22  ;;  %v1925_v13 = vsel %vm1876_vm3, %v5666_v12, 0.0 }
 0x4c4   : > { %1929 = vadd.xlane.f32.xlu0 %v1928_v11 }
 0x4ce   : > { %1926 = vadd.xlane.f32.xlu1 %v1925_v13 }
 0x508   : > { %v1888_v10 = vpop.xlane.xlu0 %1887 }
 0x509   : > { %v1904_v14 = vsub.f32 %v1871_v40, %v1888_v10 }
 0x50b   : > { %v1915_v15 = vmul.f32 1.442695, %v1904_v14 }
 0x50c   : > { %v1885_v16 = vpop.xlane.xlu0 %1884 }
 0x50d   : > { %4491 = vpow2.f32 %v1915_v15  ;;  %v1903_v17 = vsub.f32 %v1870_v42, %v1885_v16 }
 0x50f   : > { %v1913_v18 = vmul.f32 1.442695, %v1903_v17  ;;  %v4399_v17 = vld [vmem:[%s5509_s4 + $0x38] sm:$0xff]  }
 0x510   : > { %v1894_v19 = vpop.xlane.xlu0 %1893 }
 0x511   : > { %4493 = vpow2.f32 %v1913_v18  ;;  %v1906_v20 = vsub.f32 %v1873_v50, %v1894_v19  ;;  %v4400_v18 = vld [vmem:[%s5509_s4 + $0x30] sm:$0xff]   ;;  %v4401_v19 = vld [vmem:[%s5509_s4 + $0x28] sm:$0xff]  }
 0x512   : > { %v1891_v21 = vpop.xlane.xlu1 %1890 }
 0x513   : > { %v1919_v22 = vmul.f32 1.442695, %v1906_v20  ;;  %v1905_v23 = vsub.f32 %v1872_v52, %v1891_v21  ;;  %v4402_v20 = vld [vmem:[%s5509_s4 + $0x20] sm:$0xff]   ;;  %v4403_v21 = vld [vmem:[%s5509_s4 + $0x18] sm:$0xff]  }
 0x515   : > { %4495 = vpow2.f32 %v1919_v22  ;;  %v1917_v24 = vmul.f32 1.442695, %v1905_v23  ;;  %v4404_v22 = vld [vmem:[%s5509_s4 + $0x10] sm:$0xff]  }
 0x517   : > { %4497 = vpow2.f32 %v1917_v24 }
 0x518   : > { %v1900_v25 = vpop.xlane.xlu0 %1899 }
 0x519   : > { %v1908_v28 = vsub.f32 %v1875_v61, %v1900_v25  ;;  %v4405_v25 = vld [vmem:[%s5509_s4 + $0x8] sm:$0xff]  }
 0x51a   : > { %v5670_v29 = vpop.eup %4491  ;;  %v1897_v30 = vpop.xlane.xlu1 %1896 }
 0x51b   : > { %v1923_v31 = vmul.f32 1.442695, %v1908_v28  ;;  %v1907_v32 = vsub.f32 %v1874_v63, %v1897_v30  ;;  %v1934_v33 = vsel %vm1876_vm3, %v5670_v29, 0.0 }
 0x51c   : > { %1935 = vadd.xlane.f32.xlu0 %v1934_v33  ;;  %v1508_v38 = vpop.permute.xlu0 %1507 }
 0x51d   : > { %4499 = vpow2.f32 %v1923_v31  ;;  %v1921_v34 = vmul.f32 1.442695, %v1907_v32  ;;  %v4406_v32 = vld [vmem:[%s5509_s4] sm:$0xff]  }
 0x51e   : > { %v4494_v35 = vpop.eup %4493  ;;  %v1510_v36 = vpop.permute.xlu1 %1509 }
 0x51f   : > { %4501 = vpow2.f32 %v1921_v34  ;;  %4121 = vmatprep.subr.mxu1 %v1510_v36  ;;  %v1931_v37 = vsel %vm1876_vm3, %v4494_v35, 0.0 }
 0x520   : > { %1932 = vadd.xlane.f32.xlu1 %v1931_v37  ;;  %4122 = vmatpush3.msra.mxu1 %v1510_v36 }
 0x521   : > { %4123 = vmatprep.subr.mxu1 %v1508_v38 }
 0x522   : > { %v4496_v39 = vpop.eup %4495  ;;  %4124 = vmatpush3.msra.mxu1 %v1508_v38  ;;  %v1516_v40 = vpop.permute.xlu1 %1515 }
 0x523   : > { %4128 = vmatprep.subr.mxu0 %v1516_v40  ;;  %v1940_v41 = vsel %vm1876_vm3, %v4496_v39, 0.0 }
 0x524   : > { %v4498_v42 = vpop.eup %4497  ;;  %1941 = vadd.xlane.f32.xlu0 %v1940_v41 }
 0x525   : > { %v1937_v43 = vsel %vm1876_vm3, %v4498_v42, 0.0 }
 0x526   : > { %1938 = vadd.xlane.f32.xlu1 %v1937_v43  ;;  %v1522_v44 = vpop.permute.xlu1 %1521 }
 0x527   : > { %4135 = vmatprep.subr.mxu1 %v1522_v44 }
 0x52a   : > { %v4500_v45 = vpop.eup %4499 }
 0x52b   : > { %v1946_v46 = vsel %vm1876_vm3, %v4500_v45, 0.0 }
 0x52c   : > { %v4502_v49 = vpop.eup %4501  ;;  %1947 = vadd.xlane.f32.xlu0 %v1946_v46 }
 0x52d   : > { %v1943_v50 = vsel %vm1876_vm3, %v4502_v49, 0.0 }
 0x52e   : > { %1944 = vadd.xlane.f32.xlu1 %v1943_v50 }
 0x53f   : > { %1519 = vrot.lane.b32.xlu1 %v5620_v9, %s5007_s22 }
 0x542   : > { %1513 = vrot.lane.b32.xlu0 %v5620_v9, %s5006_s25 }
 0x54d   : > { %v1930_v51 = vpop.xlane.xlu0 %1929 }
 0x54e   : > { %4503 = vrcp.f32 %v1930_v51 }
 0x557   : > { %v1927_v52 = vpop.xlane.xlu1 %1926 }
 0x558   : > { %4505 = vrcp.f32 %v1927_v52 }
 0x55b   : > { %v4504_v53 = vpop.eup %4503 }
 0x55c   : > { %v1958_v58 = vmul.f32 %v4504_v53, %v5662_v8 }
 0x565   : > { %v4506_v56 = vpop.eup %4505 }
 0x566   : > { %v1957_v57 = vmul.f32 %v4506_v56, %v5666_v12 }
 0x568   : > { %4118 = vmatprep.mubr.msk.f32.mxu0 %vm1876_vm3, %v1957_v57  ;;  %v3834_v57 = vld [vmem:[%s1076_s0] ss:$0 sm:$0xff] }
 0x569   : > { %4119 = vmatmul.mubr.msk.f32.vlgmr.msra.gmra.mxu0 %vm1876_vm3, %v1958_v58 }
 0x56a   : > { %4129 = vmatpush3.msra.mxu0 %v1516_v40 }
 0x5a5   : > { %v1936_v59 = vpop.xlane.xlu0 %1935 }
 0x5a6   : > { %4507 = vrcp.f32 %v1936_v59 }
 0x5a9   : > { %v1933_v61 = vpop.xlane.xlu1 %1932 }
 0x5aa   : > { %4509 = vrcp.f32 %v1933_v61 }
 0x5ad   : > { %v1942_v9 = vpop.xlane.xlu0 %1941 }
 0x5ae   : > { %4511 = vrcp.f32 %v1942_v9 }
 0x5af   : > { %v1939_v62 = vpop.xlane.xlu1 %1938 }
 0x5b0   : > { %4513 = vrcp.f32 %v1939_v62 }
 0x5b3   : > { %v4508_v0 = vpop.eup %4507 }
 0x5b4   : > { %v1960_v6 = vmul.f32 %v4508_v0, %v5670_v29 }
 0x5b5   : > { %v1948_v63 = vpop.xlane.xlu0 %1947 }
 0x5b6   : > { %4515 = vrcp.f32 %v1948_v63 }
 0x5b7   : > { %v4510_v1 = vpop.eup %4509  ;;  %v1945_v2 = vpop.xlane.xlu1 %1944 }
 0x5b8   : > { %4517 = vrcp.f32 %v1945_v2  ;;  %v1959_v3 = vmul.f32 %v4510_v1, %v4494_v35  ;;  %v4407_v2 = vld [vmem:[%s5514_s27 + $0xe0] ss:$16 sps:$4 sm:$0xff]  }
 0x5b9   : > { %v1514_v5 = vpop.permute.xlu0 %1513 }
 0x5ba   : > { %4125 = vmatprep.mubr.msk.f32.mxu1 %vm1876_vm3, %v1959_v3  ;;  %4130 = vmatprep.subr.mxu0 %v1514_v5  ;;  %v4409_v3 = vld [vmem:[%s5514_s27 + $0xe4] ss:$16 sps:$4 sm:$0xff]  }
 0x5bb   : > { %4126 = vmatmul.mubr.msk.f32.vlgmr.msra.gmra.mxu1 %vm1876_vm3, %v1960_v6  ;;  %4131 = vmatpush3.msra.mxu0 %v1514_v5  ;;  %v1520_v7 = vpop.permute.xlu1 %1519  ;;  %v4512_v8 = vpop.eup %4511  ;;  %v4412_v5 = vld [vmem:[%s5514_s27 + $0xec] ss:$16 sps:$4 sm:$0xff]  }
 0x5bc   : > { %4136 = vmatpush3.msra.mxu1 %v1522_v44  ;;  %4142 = vmatprep.subr.bf16.mxu0 %v5003_v27  ;;  %v1962_v13 = vmul.f32 %v4512_v8, %v4496_v39 }
 0x5bd   : > { %v4514_v11 = vpop.eup %4513  ;;  %4137 = vmatprep.subr.mxu1 %v1520_v7 }
 0x5be   : > { %4138 = vmatpush3.msra.mxu1 %v1520_v7  ;;  %v1961_v12 = vmul.f32 %v4514_v11, %v4498_v42 }
 0x5bf   : > { %2692 = vmatprep.subr.bf16.mxu1 %v4409_v3  ;;  %v4459_v3 = vld [vmem:[%s5516_s1 + $0x70] sm:$0xff]  }
 0x5c0   : > { %4132 = vmatprep.mubr.msk.f32.mxu0 %vm1876_vm3, %v1961_v12 }
 0x5c1   : > { %4133 = vmatmul.mubr.msk.f32.vlgmr.msra.gmra.mxu0 %vm1876_vm3, %v1962_v13 }
 0x5c2   : > { %4158 = vmatprep.mubr.msk.bf16.mxu0 %vm5004_vm1, %v5003_v27  ;;  %4143 = vmatpush3.bf16.msra.mxu0 %v4399_v17  ;;  %v4421_v17 = vld [vmem:[%s5514_s27 + $0xa4] ss:$16 sps:$4 sm:$0xff]  }
 0x5c3   : > { %v4516_v10 = vpop.eup %4515  ;;  %4144 = vmatprep.subr.bf16.mxu0 %v5003_v27 }
 0x5c4   : > { %v1964_v16 = vmul.f32 %v4516_v10, %v4500_v45  ;;  %v4415_v10 = vld [vmem:[%s5514_s27 + $0xc4] ss:$16 sps:$4 sm:$0xff]  }
 0x5c5   : > { %v4518_v14 = vpop.eup %4517 }
 0x5c6   : > { %v1963_v15 = vmul.f32 %v4518_v14, %v4502_v49  ;;  %4145 = vmatpush3.bf16.msra.mxu0 %v4400_v18  ;;  %v4418_v14 = vld [vmem:[%s5514_s27 + $0xcc] ss:$16 sps:$4 sm:$0xff]  }
 0x5c7   : > { %4146 = vmatprep.subr.bf16.mxu0 %v5003_v27  ;;  %v4424_v18 = vld [vmem:[%s5514_s27 + $0xac] ss:$16 sps:$4 sm:$0xff]  }
 0x5c8   : > { %4139 = vmatprep.mubr.msk.f32.mxu1 %vm1876_vm3, %v1963_v15  ;;  %v4413_v15 = vld [vmem:[%s5514_s27 + $0xc0] ss:$16 sps:$4 sm:$0xff]  }
 0x5c9   : > { %4140 = vmatmul.mubr.msk.f32.vlgmr.msra.gmra.mxu1 %vm1876_vm3, %v1964_v16  ;;  %v4416_v16 = vld [vmem:[%s5514_s27 + $0xc8] ss:$16 sps:$4 sm:$0xff]  }
 0x5ca   : > { %2724 = vmatprep.mubr.bf16.mxu1 %v5002_v26  ;;  %4147 = vmatpush3.bf16.msra.mxu0 %v4401_v19  ;;  %v4419_v19 = vld [vmem:[%s5514_s27 + $0xa0] ss:$16 sps:$4 sm:$0xff]  }
 0x5cb   : > { %4148 = vmatprep.subr.bf16.mxu0 %v5003_v27  ;;  %2693 = vmatpush1.bf16.msra.mxu1 %v4407_v2 }
 0x5cc   : > { %2694 = vmatprep.subr.bf16.mxu1 %v4415_v10  ;;  %v4470_v10 = vld [vmem:[%s5516_s1 + $0xa0] sm:$0xff]  }
 0x5ce   : > { %4149 = vmatpush3.bf16.msra.mxu0 %v4402_v20  ;;  %v4422_v20 = vld [vmem:[%s5514_s27 + $0xa8] ss:$16 sps:$4 sm:$0xff]  }
 0x5cf   : > { %4150 = vmatprep.subr.bf16.mxu0 %v5003_v27  ;;  %2695 = vmatpush1.bf16.msra.mxu1 %v4413_v15  ;;  %v4472_v15 = vld [vmem:[%s5516_s1 + $0xd8] sm:$0xff]  }
 0x5d0   : > { %2696 = vmatprep.subr.bf16.mxu1 %v4421_v17  ;;  %v4474_v17 = vld [vmem:[%s5516_s1 + $0x98] sm:$0xff]  }
 0x5d2   : > { %4151 = vmatpush3.bf16.msra.mxu0 %v4403_v21  ;;  %v4425_v21 = vld [vmem:[%s5514_s27 + $0x80] ss:$16 sps:$4 sm:$0xff]  }
 0x5d3   : > { %4152 = vmatprep.subr.bf16.mxu0 %v5003_v27  ;;  %2697 = vmatpush1.bf16.msra.mxu1 %v4419_v19  ;;  %v4476_v19 = vld [vmem:[%s5516_s1 + $0xd0] sm:$0xff]  }
 0x5d6   : > { %4153 = vmatpush3.bf16.msra.mxu0 %v4404_v22  ;;  %v4427_v22 = vld [vmem:[%s5514_s27 + $0x84] ss:$16 sps:$4 sm:$0xff]  }
 0x5d7   : > { %4154 = vmatprep.subr.bf16.mxu0 %v5003_v27  ;;  %2698 = vmatprep.subr.bf16.mxu1 %v4427_v22  ;;  %v4479_v22 = vld [vmem:[%s5516_s1 + $0x48] sm:$0xff]  }
 0x5d8   : > { %2699 = vmatpush1.bf16.msra.mxu1 %v4425_v21  ;;  %v4478_v21 = vld [vmem:[%s5516_s1 + $0x90] sm:$0xff]  }
 0x5da   : > { %4155 = vmatpush3.bf16.msra.mxu0 %v4405_v25  ;;  %v4433_v25 = vld [vmem:[%s5514_s27 + $0x64] ss:$16 sps:$4 sm:$0xff]  }
 0x5db   : > { %4156 = vmatprep.subr.bf16.mxu0 %v5003_v27  ;;  %2700 = vmatprep.subr.bf16.mxu1 %v4433_v25  ;;  %v4482_v25 = vld [vmem:[%s5516_s1 + $0x88] sm:$0xff]  }
 0x5de   : > { %4157 = vmatpush3.bf16.msra.mxu0 %v4406_v32  ;;  %v4442_v32 = vld [vmem:[%s5514_s27 + $0x4c] ss:$16 sps:$4 sm:$0xff]  }
 0x5df   : > { %2735 = vmatprep.subr.bf16.mxu0 %v4412_v5  ;;  %v4461_v5 = vld [vmem:[%s5516_s1 + $0x30] sm:$0xff]  }
 0x629   : > { %v4120_v23 = vpop.f32.mrf.mxu0 }
 0x62b   : > { %v2037_v30 = vpop.f32.mrf.mxu0 }
 0x67b   : > { %v4127_v24 = vpop.f32.mrf.mxu1 }
 0x67d   : > { %v2118_v28 = vpop.f32.mrf.mxu1 }
 0x67e   : > { %v4352_v29 = vpack.i.bf16 %v4127_v24, %v2118_v28  ;;  %v4430_v24 = vld [vmem:[%s5514_s27 + $0x8c] ss:$16 sps:$4 sm:$0xff]  }
 0x67f   : > { %v4436_v28 = vld [vmem:[%s5514_s27 + $0x6c] ss:$16 sps:$4 sm:$0xff]  }
 0x680   : > { %4353 = vrot.lane.b32.xlu0 %v4352_v29, %s5007_s22  ;;  %v4431_v29 = vld [vmem:[%s5514_s27 + $0x60] ss:$16 sps:$4 sm:$0xff]  }
 0x681   : > { %v4134_v31 = vpop.f32.mrf.mxu0  ;;  %2701 = vmatpush1.bf16.msra.mxu1 %v4431_v29  ;;  %v4484_v29 = vld [vmem:[%s5516_s1 + $0xc0] sm:$0xff]  }
 0x683   : > { %v2199_v33 = vpop.f32.mrf.mxu0 }
 0x684   : > { %v4357_v34 = vpack.i.bf16 %v4134_v31, %v2199_v33  ;;  %v4439_v31 = vld [vmem:[%s5514_s27 + $0x44] ss:$16 sps:$4 sm:$0xff]   ;;  %v4437_v33 = vld [vmem:[%s5514_s27 + $0x40] ss:$16 sps:$4 sm:$0xff]  }
 0x685   : > { %2702 = vmatprep.subr.bf16.mxu1 %v4439_v31  ;;  %v4486_v31 = vld [vmem:[%s5516_s1 + $0x80] sm:$0xff]  }
 0x686   : > { %4358 = vrot.lane.b32.xlu1 %v4357_v34, %s5006_s25  ;;  %v4440_v34 = vld [vmem:[%s5514_s27 + $0x48] ss:$16 sps:$4 sm:$0xff]   ;;  %2703 = vmatpush1.bf16.msra.mxu1 %v4437_v33  ;;  %v2510_v33 = vld [vmem:[%s5542_s10] sm:$0xf] }
 0x689   : > { %v4141_v35 = vpop.f32.mrf.mxu1 }
 0x68b   : > { %v2280_v36 = vpop.f32.mrf.mxu1 }
 0x68c   : > { %v4362_v37 = vpack.i.bf16 %v4141_v35, %v2280_v36  ;;  %v4445_v35 = vld [vmem:[%s5514_s27 + $0x24] ss:$16 sps:$4 sm:$0xff]   ;;  %v4448_v36 = vld [vmem:[%s5514_s27 + $0x2c] ss:$16 sps:$4 sm:$0xff]  }
 0x68d   : > { %2704 = vmatprep.subr.bf16.mxu1 %v4445_v35 }
 0x68e   : > { %4363 = vrot.lane.b32.xlu0 %v4362_v37, %s5005_s30  ;;  %v4443_v37 = vld [vmem:[%s5514_s27 + $0x20] ss:$16 sps:$4 sm:$0xff]  }
 0x68f   : > { %2705 = vmatpush1.bf16.msra.mxu1 %v4443_v37 }
 0x6f2   : > { %v4354_v38 = vpop.permute.xlu0 %4353 }
 0x6f3   : > { %v4356_v40 = vunpack.i.h.bf16 %v4354_v38  ;;  %v4355_v41 = vunpack.i.l.bf16 %v4354_v38  ;;  %v4446_v38 = vld [vmem:[%s5514_s27 + $0x28] ss:$16 sps:$4 sm:$0xff]  }
 0x6f5   : > { %v2314_v44 = vsel %vm1525_vm2, %v4120_v23, %v4356_v40  ;;  %v2313_v45 = vsel %vm1525_vm2, %v2037_v30, %v4355_v41  ;;  %v4428_v23 = vld [vmem:[%s5514_s27 + $0x88] ss:$16 sps:$4 sm:$0xff]   ;;  %v4454_v40 = vld [vmem:[%s5514_s27 + $0xc] ss:$16 sps:$4 sm:$0xff]   ;;  %v4449_v41 = vld [vmem:[%s5514_s27] ss:$16 sps:$4 sm:$0xff]  }
 0x6f6   : > { %v4434_v30 = vld [vmem:[%s5514_s27 + $0x68] ss:$16 sps:$4 sm:$0xff]  }
 0x6f8   : > { %v4359_v39 = vpop.permute.xlu1 %4358 }
 0x6f9   : > { %v4361_v42 = vunpack.i.h.bf16 %v4359_v39  ;;  %v4360_v43 = vunpack.i.l.bf16 %v4359_v39  ;;  %v4451_v39 = vld [vmem:[%s5514_s27 + $0x4] ss:$16 sps:$4 sm:$0xff]  }
 0x6fa   : > { %2706 = vmatprep.subr.bf16.mxu1 %v4451_v39  ;;  %v2523_v39 = vrot.slane %v2510_v33, %v1260_v4 }
 0x6fb   : > { %v2317_v50 = vsel %vm2315_vm4, %v2314_v44, %v4361_v42  ;;  %v2316_v51 = vsel %vm2315_vm4, %v2313_v45, %v4360_v43  ;;  %v4452_v42 = vld [vmem:[%s5514_s27 + $0x8] ss:$16 sps:$4 sm:$0xff]   ;;  %2707 = vmatpush1.bf16.msra.mxu1 %v4449_v41 }
 0x6fc   : > { %v4455_v43 = vld [vmem:[%s5516_s1 + $0x78] sm:$0xff]  }
 0x6fd   : > { %3991 = vmatprep.subr.bf16.mxu1 %v4455_v43 }
 0x700   : > { %v4364_v27 = vpop.permute.xlu0 %4363 }
 0x701   : > { %v4366_v46 = vunpack.i.h.bf16 %v4364_v27  ;;  %v4365_v49 = vunpack.i.l.bf16 %v4364_v27  ;;  %v4456_v27 = vld [vmem:[%s5516_s1 + $0xf8] sm:$0xff]  }
 0x703   : > { %v2319_v52 = vsel %vm2318_vm5, %v2316_v51, %v4365_v49  ;;  %v2320_v53 = vsel %vm2318_vm5, %v2317_v50, %v4366_v46 }
 0x704   : > { %v2321_v56 = vpack.c.bf16 %v2320_v53, %v2319_v52 }
 0x706   : > { %4159 = vmatmul.mubr.bf16.vlgmr.msra.gmra.mxu0 %v2321_v56  ;;  %v3843_v56 = vld [vmem:[%s1079_s2] ss:$0 sm:$0xff]  ;;  %s6019_s2 = sld [smem:[#allocation30_spill]] }
 0x707   : > { %2767 = vmatprep.mubr.bf16.mxu0 %v5002_v26  ;;  %v4410_v26 = vld [vmem:[%s5514_s27 + $0xe8] ss:$16 sps:$4 sm:$0xff]  }
 0x708   : > { %2736 = vmatpush1.bf16.msra.mxu0 %v4410_v26  ;;  %v4460_v26 = vld [vmem:[%s5516_s1 + $0xf0] sm:$0xff]  }
 0x709   : > { %2737 = vmatprep.subr.bf16.mxu0 %v4418_v14  ;;  %v4471_v14 = vld [vmem:[%s5516_s1 + $0x58] sm:$0xff]  }
 0x70c   : > { %2738 = vmatpush1.bf16.msra.mxu0 %v4416_v16  ;;  %v4473_v16 = vld [vmem:[%s5516_s1 + $0x18] sm:$0xff]   ;;  %p3912_p6 = scmp.ne.s32.totalorder %s6019_s2, 3 }
 0x70d   : > { %2739 = vmatprep.subr.bf16.mxu0 %v4424_v18  ;;  %v4475_v18 = vld [vmem:[%s5516_s1 + $0x50] sm:$0xff]   ;;  %s6020_s20 = sld [smem:[#allocation47_spill]] (!%p3912_p6) }
 0x70e   : > { %s6022_s17 = sld [smem:[#allocation48_spill]] (!%p3912_p6) }
 0x70f   : > { %s6023_s22 = sld [smem:[#allocation50_spill]] (!%p3912_p6) }
 0x710   : > { %2740 = vmatpush1.bf16.msra.mxu0 %v4422_v20  ;;  %v4477_v20 = vld [vmem:[%s5516_s1 + $0x10] sm:$0xff]  }
 0x711   : > { %2741 = vmatprep.subr.bf16.mxu0 %v4430_v24  ;;  %v4481_v24 = vld [vmem:[%s5516_s1 + $0x8] sm:$0xff]  }
 0x714   : > { %2742 = vmatpush1.bf16.msra.mxu0 %v4428_v23  ;;  %v4480_v23 = vld [vmem:[%s5516_s1 + $0xc8] sm:$0xff]  }
 0x715   : > { %2743 = vmatprep.subr.bf16.mxu0 %v4436_v28  ;;  %v4483_v28 = vld [vmem:[%s5516_s1 + $0x40] sm:$0xff]  }
 0x718   : > { %2744 = vmatpush1.bf16.msra.mxu0 %v4434_v30  ;;  %v4485_v30 = vld [vmem:[%s5516_s1] sm:$0xff]  }
 0x719   : > { %2745 = vmatprep.subr.bf16.mxu0 %v4442_v32  ;;  %v2526_v32 = vsub.s32 3, %v5590_v54 }
 0x71b   : > { %v2527_v37 = vrot.slane %v2510_v33, %v2526_v32 }
 0x71c   : > { %2746 = vmatpush1.bf16.msra.mxu0 %v4440_v34 }
 0x71d   : > { %2747 = vmatprep.subr.bf16.mxu0 %v4448_v36  ;;  %v2519_v36 = vrot.slane %v2510_v33, %v1256_v60 }
 0x720   : > { %2748 = vmatpush1.bf16.msra.mxu0 %v4446_v38  ;;  %v2515_v38 = vrot.slane %v2510_v33, %v1252_v55 }
 0x721   : > { %2749 = vmatprep.subr.bf16.mxu0 %v4454_v40 }
 0x724   : > { %2750 = vmatpush1.bf16.msra.mxu0 %v4452_v42 }
 0x725   : > { %4013 = vmatprep.subr.bf16.mxu0 %v4456_v27 }
 0x7c6   : > { %v2427_v58 = vpop.f32.mrf.mxu0 }
 0x7c7   : > { %v2428_v59 = vadd.f32 %v3834_v57, %v2427_v58 }
 0x7c8   : > { %v4160_v61 = vpop.f32.mrf.mxu0 }
 0x7c9   : > { %v2434_v9 = vadd.f32 %v2428_v59, %v5575_v47  ;;  %v3844_v61 = vld [vmem:[%s6015_s26] ss:$0 sm:$0xff] }
 0x7ca   : > { %v2430_v62 = vpop.f32.mrf.mxu0 }
 0x7cb   : > { %v2431_v63 = vadd.f32 %v3834_v57, %v2430_v62  ;;  %2438 = vadd.xlane.f32.xlu1 %v2434_v9 }
 0x7cc   : > { %v4161_v0 = vpop.f32.mrf.mxu0 }
 0x7cd   : > { %v2435_v1 = vadd.f32 %v2431_v63, %v5577_v48  ;;  %v4457_v0 = vld [vmem:[%s5516_s1 + $0x38] sm:$0xff]  }
 0x7cf   : > { %2440 = vadd.xlane.f32.xlu0 %v2435_v1 }
 0x854   : > { %v2439_v47 = vpop.xlane.xlu1 %2438 }
 0x855   : > { %v2443_v6 = vmul.f32 0.0078125, %v2439_v47  ;;  %v4462_v47 = vld [vmem:[%s5516_s1 + $0xb0] sm:$0xff]  }
 0x857   : > { %v5730_v7 = vsub.f32 %v2434_v9, %v2443_v6  ;;  %v4463_v6 = vld [vmem:[%s5516_s1 + $0x68] sm:$0xff]  }
 0x858   : > { %v2441_v8 = vpop.xlane.xlu0 %2440 }
 0x859   : > { %v2444_v48 = vmul.f32 0.0078125, %v2441_v8  ;;  %v2447_v11 = vmul.f32 %v5730_v7, %v5730_v7  ;;  %v4465_v8 = vld [vmem:[%s5516_s1 + $0x28] sm:$0xff]  }
 0x85b   : > { %v5734_v12 = vsub.f32 %v2435_v1, %v2444_v48  ;;  %2449 = vadd.xlane.f32.xlu0 %v2447_v11  ;;  %v4458_v1 = vld [vmem:[%s5516_s1 + $0xb8] sm:$0xff]   ;;  %v4466_v48 = vld [vmem:[%s5516_s1 + $0xa8] sm:$0xff]   ;;  %v4467_v11 = vld [vmem:[%s5516_s1 + $0x60] sm:$0xff]  }
 0x85d   : > { %v2448_v13 = vmul.f32 %v5734_v12, %v5734_v12 }
 0x85f   : > { %2451 = vadd.xlane.f32.xlu1 %v2448_v13  ;;  %v4469_v13 = vld [vmem:[%s5516_s1 + $0x20] sm:$0xff]  }
 0x8e4   : > { %v2450_v44 = vpop.xlane.xlu0 %2449 }
 0x8e5   : > { %v2453_v45 = vmul.f32 0.0078125, %v2450_v44 }
 0x8e7   : > { %v2455_v46 = vadd.f32 1e-05, %v2453_v45 }
 0x8e8   : > { %v2452_v49 = vpop.xlane.xlu1 %2451 }
 0x8e9   : > { %4519 = vrsqrt.f32 %v2455_v46  ;;  %v2454_v50 = vmul.f32 0.0078125, %v2452_v49 }
 0x8eb   : > { %v2456_v51 = vadd.f32 1e-05, %v2454_v50 }
 0x8ed   : > { %4521 = vrsqrt.f32 %v2456_v51 }
 0x8f6   : > { %v4520_v52 = vpop.eup %4519 }
 0x8f7   : > { %v2459_v53 = vmul.f32 %v4520_v52, %v5730_v7  ;;  %v4464_v7 = vld [vmem:[%s5516_s1 + $0xe8] sm:$0xff]  }
 0x8f9   : > { %v2467_v59 = vmul.f32 %v3843_v56, %v2459_v53 }
 0x8fa   : > { %v4522_v57 = vpop.eup %4521 }
 0x8fb   : > { %v2460_v58 = vmul.f32 %v4522_v57, %v5734_v12  ;;  %v5777_v62 = vadd.f32 %v3844_v61, %v2467_v59  ;;  %v4468_v12 = vld [vmem:[%s5516_s1 + $0xe0] sm:$0xff]  }
 0x8fd   : > { %v2468_v9 = vmul.f32 %v3843_v56, %v2460_v58 }
 0x8ff   : > { %v5779_v63 = vadd.f32 %v3844_v61, %v2468_v9 }
 0x901   : > { %v2477_v2 = vpack.c.bf16 %v5779_v63, %v5777_v62 }
 0x903   : > { %2725 = vmatmul.mubr.bf16.vlgmr.msra.gmra.mxu1 %v2477_v2  ;;  %2768 = vmatmul.mubr.bf16.vlgmr.msra.gmra.mxu0 %v2477_v2 }
 0x904   : > { %3992 = vmatpush3.bf16.msra.mxu1 %v4457_v0  ;;  %4014 = vmatpush3.bf16.msra.mxu0 %v4458_v1 }
 0x905   : > { %3993 = vmatprep.subr.bf16.mxu1 %v4459_v3  ;;  %4015 = vmatprep.subr.bf16.mxu0 %v4460_v26 }
 0x908   : > { %3994 = vmatpush3.bf16.msra.mxu1 %v4461_v5  ;;  %4016 = vmatpush3.bf16.msra.mxu0 %v4462_v47  ;;  %v3877_v5 = vld [vmem:[%s1086_s16] ss:$0 sm:$0xff]  ;;  %s6021_s16 = sld [smem:[#allocation49_spill]] (!%p3912_p6) }
 0x909   : > { %3995 = vmatprep.subr.bf16.mxu1 %v4463_v6  ;;  %4017 = vmatprep.subr.bf16.mxu0 %v4464_v7 }
 0x90c   : > { %3996 = vmatpush3.bf16.msra.mxu1 %v4465_v8  ;;  %4018 = vmatpush3.bf16.msra.mxu0 %v4466_v48 }
 0x90d   : > { %3997 = vmatprep.subr.bf16.mxu1 %v4467_v11  ;;  %4019 = vmatprep.subr.bf16.mxu0 %v4468_v12 }
 0x910   : > { %3998 = vmatpush3.bf16.msra.mxu1 %v4469_v13  ;;  %4020 = vmatpush3.bf16.msra.mxu0 %v4470_v10 }
 0x911   : > { %3999 = vmatprep.subr.bf16.mxu1 %v4471_v14  ;;  %4021 = vmatprep.subr.bf16.mxu0 %v4472_v15 }
 0x914   : > { %4000 = vmatpush3.bf16.msra.mxu1 %v4473_v16  ;;  %4022 = vmatpush3.bf16.msra.mxu0 %v4474_v17 }
 0x915   : > { %4001 = vmatprep.subr.bf16.mxu1 %v4475_v18  ;;  %4023 = vmatprep.subr.bf16.mxu0 %v4476_v19 }
 0x918   : > { %4002 = vmatpush3.bf16.msra.mxu1 %v4477_v20  ;;  %4024 = vmatpush3.bf16.msra.mxu0 %v4478_v21 }
 0x919   : > { %4003 = vmatprep.subr.bf16.mxu1 %v4479_v22  ;;  %4025 = vmatprep.subr.bf16.mxu0 %v4480_v23 }
 0x91c   : > { %4004 = vmatpush3.bf16.msra.mxu1 %v4481_v24  ;;  %4026 = vmatpush3.bf16.msra.mxu0 %v4482_v25 }
 0x91d   : > { %4005 = vmatprep.subr.bf16.mxu1 %v4483_v28  ;;  %4027 = vmatprep.subr.bf16.mxu0 %v4484_v29 }
 0x920   : > { %4006 = vmatpush3.bf16.msra.mxu1 %v4485_v30  ;;  %4028 = vmatpush3.bf16.msra.mxu0 %v4486_v31 }
 0x9c3   : > { %v2726_v34 = vpop.f32.mrf.mxu1  ;;  %v2769_v35 = vpop.f32.mrf.mxu0 }
 0x9c4   : > { %v2727_v49 = vadd.f32 %v2726_v34, %v2515_v38  ;;  %v2770_v50 = vadd.f32 %v2769_v35, %v2523_v39 }
 0x9c5   : > { %v2728_v40 = vpop.f32.mrf.mxu1  ;;  %v2771_v41 = vpop.f32.mrf.mxu0 }
 0x9c6   : > { %v2729_v27 = vadd.f32 %v2728_v40, %v2519_v36  ;;  %v2772_v44 = vadd.f32 %v2771_v41, %v2527_v37  ;;  %v2778_v59 = vmax.f32 %v2727_v49, 0.0  ;;  %v2780_v61 = vmax.f32 %v2770_v50, 0.0 }
 0x9c7   : > { %v2730_v42 = vpop.f32.mrf.mxu1  ;;  %v2773_v43 = vpop.f32.mrf.mxu0 }
 0x9c8   : > { %v2731_v45 = vadd.f32 %v2730_v42, %v2515_v38  ;;  %v2774_v46 = vadd.f32 %v2773_v43, %v2523_v39  ;;  %v2779_v55 = vmax.f32 %v2729_v27, 0.0  ;;  %v2781_v54 = vmax.f32 %v2772_v44, 0.0  ;;  %v3911_v38 = vld [vmem:[%s6018_s29] ss:$0 sm:$0xff] }
 0x9c9   : > { %v2732_v51 = vpop.f32.mrf.mxu1  ;;  %v2775_v52 = vpop.f32.mrf.mxu0 }
 0x9ca   : > { %v2733_v60 = vadd.f32 %v2732_v51, %v2519_v36  ;;  %v2776_v53 = vadd.f32 %v2775_v52, %v2527_v37  ;;  %v2782_v56 = vmax.f32 %v2731_v45, 0.0  ;;  %v2784_v57 = vmax.f32 %v2774_v46, 0.0  ;;  %v3910_v36 = vld [vmem:[%s6017_s18] ss:$0 sm:$0xff] }
 0x9cc   : > { %v2783_v4 = vmax.f32 %v2733_v60, 0.0  ;;  %v2785_v58 = vmax.f32 %v2776_v53, 0.0  ;;  %v2786_v1 = vpack.c.bf16 %v2782_v56, %v2778_v59  ;;  %v2788_v2 = vpack.c.bf16 %v2784_v57, %v2780_v61 }
 0x9ce   : > { %v2787_v9 = vpack.c.bf16 %v2783_v4, %v2779_v55  ;;  %v2789_v0 = vpack.c.bf16 %v2785_v58, %v2781_v54 }
 0x9d0   : > { %3085 = vmatprep.mubr.bf16.mxu1 %v2787_v9  ;;  %3126 = vmatprep.mubr.bf16.mxu0 %v2789_v0 }
 0x9d1   : > { %3086 = vmatmul.mubr.bf16.vlgmr.msra.gmra.mxu1 %v2786_v1  ;;  %3127 = vmatmul.mubr.bf16.vlgmr.msra.gmra.mxu0 %v2788_v2 }
 0xa91   : > { %v4007_v3 = vpop.f32.mrf.mxu1  ;;  %v4029_v26 = vpop.f32.mrf.mxu0 }
 0xa93   : > { %v4008_v47 = vpop.f32.mrf.mxu1  ;;  %v4030_v6 = vpop.f32.mrf.mxu0 }
 0xa94   : > { %v4009_v7 = vadd.f32 %v4008_v47, %v4007_v3  ;;  %v4031_v12 = vadd.f32 %v4030_v6, %v4029_v26 }
 0xa95   : > { %v4010_v8 = vpop.f32.mrf.mxu1  ;;  %v4032_v48 = vpop.f32.mrf.mxu0 }
 0xa96   : > { %v3088_v11 = vadd.f32 %v4009_v7, %v3877_v5 }
 0xa97   : > { %v4011_v13 = vpop.f32.mrf.mxu1  ;;  %v4033_v10 = vpop.f32.mrf.mxu0 }
 0xa98   : > { %v3129_v14 = vadd.f32 %v4031_v12, %v3088_v11  ;;  %v4012_v15 = vadd.f32 %v4011_v13, %v4010_v8  ;;  %v4034_v17 = vadd.f32 %v4033_v10, %v4032_v48 }
 0xa9a   : > { %v3091_v16 = vadd.f32 %v4012_v15, %v3877_v5  ;;  %v3135_v18 = vadd.f32 %v3129_v14, %v5777_v62 }
 0xa9c   : > { %v3132_v19 = vadd.f32 %v4034_v17, %v3091_v16  ;;  %3139 = vadd.xlane.f32.xlu0 %v3135_v18 }
 0xa9e   : > { %v3136_v20 = vadd.f32 %v3132_v19, %v5779_v63 }
 0xaa0   : > { %3141 = vadd.xlane.f32.xlu1 %v3136_v20 }
 0xb25   : > { %v3140_v21 = vpop.xlane.xlu0 %3139 }
 0xb26   : > { %v3143_v22 = vmul.f32 0.0078125, %v3140_v21 }
 0xb28   : > { %v3145_v23 = vsub.f32 %v3135_v18, %v3143_v22 }
 0xb29   : > { %v3142_v24 = vpop.xlane.xlu1 %3141 }
 0xb2a   : > { %v3144_v25 = vmul.f32 0.0078125, %v3142_v24  ;;  %v3147_v28 = vmul.f32 %v3145_v23, %v3145_v23 }
 0xb2c   : > { %v3146_v29 = vsub.f32 %v3136_v20, %v3144_v25  ;;  %3149 = vadd.xlane.f32.xlu0 %v3147_v28 }
 0xb2e   : > { %v3148_v30 = vmul.f32 %v3146_v29, %v3146_v29 }
 0xb30   : > { %3151 = vadd.xlane.f32.xlu1 %v3148_v30 }
 0xbb5   : > { %v3150_v31 = vpop.xlane.xlu0 %3149 }
 0xbb6   : > { %v3153_v32 = vmul.f32 0.0078125, %v3150_v31 }
 0xbb8   : > { %v3155_v62 = vadd.f32 1e-05, %v3153_v32 }
 0xbb9   : > { %v3152_v33 = vpop.xlane.xlu1 %3151 }
 0xbba   : > { %4523 = vrsqrt.f32 %v3155_v62  ;;  %v3154_v34 = vmul.f32 0.0078125, %v3152_v33 }
 0xbbc   : > { %v3156_v63 = vadd.f32 1e-05, %v3154_v34 }
 0xbbe   : > { %4525 = vrsqrt.f32 %v3156_v63 }
 0xbc7   : > { %v4524_v35 = vpop.eup %4523 }
 0xbc8   : > { %v3159_v37 = vmul.f32 %v4524_v35, %v3145_v23 }
 0xbca   : > { %v3167_v39 = vmul.f32 %v3910_v36, %v3159_v37 }
 0xbcb   : > { %v4526_v40 = vpop.eup %4525 }
 0xbcc   : > { %v5832_v41 = vadd.f32 %v3911_v38, %v3167_v39  ;;  %v3160_v42 = vmul.f32 %v4526_v40, %v3146_v29 }
 0xbce   : > { %3177 = vst [vmem:[#allocation2] sm:$0xff] %v5832_v41  ;;  %v3168_v43 = vmul.f32 %v3910_v36, %v3160_v42  ;;  %3182 = sbr.rel (%p3912_p6) target bundleno = 3772 (0xebc), region = 172 }
 0xbd0   : > { %v5835_v27 = vadd.f32 %v3911_v38, %v3168_v43 }
 0xbd2   : > { %3178 = vst [vmem:[#allocation2 + $0x8] sm:$0xff] %v5835_v27 }
 0xbd3   : > { %v3913_v44 = vld [vmem:[%s6020_s20] ss:$0 sm:$0xff]  ;;  %v5008_v49 = vmov 0   ;;  %v4529_v50 = vld [vmem:[#allocation20 + $0x38] sm:$0xff]   ;;  %v5009_v51 = vmov 0.0   ;;  %vm3205_vm6 = vcmask 7168  }
 0xbd4   : > { %v3190_v45 = vmul.f32 %v3913_v44, %v5832_v41  ;;  %v3191_v46 = vmul.f32 %v3913_v44, %v5835_v27  ;;  %4527 = vset.pattern.permute.xlu1 %v5008_v49  ;;  %4528 = vset.pattern.permute.xlu0 %v5008_v49  ;;  %v4530_v52 = vld [vmem:[#allocation20 + $0x30] sm:$0xff]   ;;  %v3914_v60 = vld [vmem:[#allocation3] ss:$0 sm:$0xff]  ;;  %v4531_v29 = vld [vmem:[#allocation20 + $0x28] sm:$0xff]   ;;  %vm5010_vm7 = vmmov 0   ;;  %vm3297_vm8 = vcmask 1041409  }
 0xbd5   : > { %4162 = vmatprep.subr.bf16.mxu0 %v5009_v51  ;;  %4182 = vmatprep.subr.mxu1 %v5009_v51  ;;  %v4532_v32 = vld [vmem:[#allocation20 + $0x20] sm:$0xff]   ;;  %v4533_v34 = vld [vmem:[#allocation20 + $0x18] sm:$0xff]   ;;  %v4534_v63 = vld [vmem:[#allocation20 + $0x10] sm:$0xff]   ;;  %vm3468_vm9 = vcmask 9216  }
 0xbd6   : > { %3192 = vadd.xlane.f32.xlu0 %v3190_v45  ;;  %4163 = vmatpush3.bf16.msra.mxu0 %v4529_v50  ;;  %v4535_v35 = vld [vmem:[#allocation20 + $0x8] sm:$0xff]   ;;  %v4536_v36 = vld [vmem:[#allocation20] sm:$0xff]  }
 0xbd7   : > { %4164 = vmatprep.subr.bf16.mxu0 %v5009_v51  ;;  %4178 = vmatprep.mubr.msk.bf16.mxu0 %vm5010_vm7, %v5009_v51 }
 0xbd8   : > { %4184 = vmatprep.mubr.msk.f32.mxu1 %vm5010_vm7, %v5009_v51 }
 0xbda   : > { %3194 = vadd.xlane.f32.xlu0 %v3191_v46  ;;  %4165 = vmatpush3.bf16.msra.mxu0 %v4530_v52 }
 0xbdb   : > { %4166 = vmatprep.subr.bf16.mxu0 %v5009_v51 }
 0xbde   : > { %4167 = vmatpush3.bf16.msra.mxu0 %v4531_v29 }
 0xbdf   : > { %4168 = vmatprep.subr.bf16.mxu0 %v5009_v51 }
 0xbe2   : > { %4169 = vmatpush3.bf16.msra.mxu0 %v4532_v32 }
 0xbe3   : > { %4170 = vmatprep.subr.bf16.mxu0 %v5009_v51 }
 0xbe6   : > { %4171 = vmatpush3.bf16.msra.mxu0 %v4533_v34 }
 0xbe7   : > { %4172 = vmatprep.subr.bf16.mxu0 %v5009_v51 }
 0xbea   : > { %4173 = vmatpush3.bf16.msra.mxu0 %v4534_v63 }
 0xbeb   : > { %4174 = vmatprep.subr.bf16.mxu0 %v5009_v51 }
 0xbee   : > { %4175 = vmatpush3.bf16.msra.mxu0 %v4535_v35 }
 0xbef   : > { %4176 = vmatprep.subr.bf16.mxu0 %v5009_v51 }
 0xbf2   : > { %4177 = vmatpush3.bf16.msra.mxu0 %v4536_v36 }
 0xc5f   : > { %v3193_v53 = vpop.xlane.xlu0 %3192 }
 0xc60   : > { %v3203_v56 = vadd.f32 %v3914_v60, %v3193_v53 }
 0xc62   : > { %v3206_v57 = vsel %vm3205_vm6, %v3203_v56, -inf }
 0xc63   : > { %v3207_v55 = vrot.slane %v3206_v57, 4  ;;  %v3195_v54 = vpop.xlane.xlu0 %3194 }
 0xc64   : > { %v3204_v4 = vadd.f32 %v3914_v60, %v3195_v54 }
 0xc65   : > { %v3208_v58 = vmax.f32 %v3206_v57, %v3207_v55 }
 0xc66   : > { %v3213_v59 = vsel %vm3205_vm6, %v3204_v4, -inf }
 0xc67   : > { %v3209_v61 = vrot.slane %v3208_v58, 2  ;;  %v3214_v9 = vrot.slane %v3213_v59, 4 }
 0xc69   : > { %v3210_v0 = vmax.f32 %v3208_v58, %v3209_v61  ;;  %v3215_v1 = vmax.f32 %v3213_v59, %v3214_v9  ;;  %v3915_v59 = vld [vmem:[%s6022_s17] ss:$0 sm:$0xff] }
 0xc6b   : > { %v3211_v2 = vrot.slane %v3210_v0, 1  ;;  %v3216_v3 = vrot.slane %v3215_v1, 2 }
 0xc6d   : > { %v3212_v26 = vmax.f32 %v3210_v0, %v3211_v2  ;;  %v3217_v5 = vmax.f32 %v3215_v1, %v3216_v3 }
 0xc6f   : > { %v3220_v47 = vsub.f32 %v3203_v56, %v3212_v26  ;;  %v3218_v6 = vrot.slane %v3217_v5, 1  ;;  %v3924_v26 = vld [vmem:[%s6023_s22] ss:$0 sm:$0xff] }
 0xc71   : > { %v3222_v7 = vmul.f32 1.442695, %v3220_v47  ;;  %v3219_v8 = vmax.f32 %v3217_v5, %v3218_v6 }
 0xc73   : > { %4537 = vpow2.f32 %v3222_v7  ;;  %v3221_v48 = vsub.f32 %v3204_v4, %v3219_v8 }
 0xc75   : > { %v3224_v11 = vmul.f32 1.442695, %v3221_v48 }
 0xc77   : > { %4539 = vpow2.f32 %v3224_v11 }
 0xc80   : > { %v4538_v12 = vpop.eup %4537 }
 0xc81   : > { %v3226_v13 = vsel %vm3205_vm6, %v4538_v12, 0.0 }
 0xc82   : > { %v3227_v10 = vrot.slane %v3226_v13, 4 }
 0xc84   : > { %v4540_v14 = vpop.eup %4539  ;;  %v3228_v15 = vadd.f32 %v3227_v10, %v3226_v13 }
 0xc85   : > { %v3233_v16 = vsel %vm3205_vm6, %v4540_v14, 0.0 }
 0xc86   : > { %v3229_v17 = vrot.slane %v3228_v15, 2  ;;  %v3234_v18 = vrot.slane %v3233_v16, 4 }
 0xc88   : > { %v3230_v19 = vadd.f32 %v3229_v17, %v3228_v15  ;;  %v3235_v20 = vadd.f32 %v3234_v18, %v3233_v16 }
 0xc8a   : > { %v3231_v21 = vrot.slane %v3230_v19, 1  ;;  %v3236_v22 = vrot.slane %v3235_v20, 2 }
 0xc8c   : > { %v3232_v23 = vadd.f32 %v3231_v21, %v3230_v19  ;;  %v3237_v24 = vadd.f32 %v3236_v22, %v3235_v20 }
 0xc8e   : > { %4541 = vrcp.f32 %v3232_v23  ;;  %v3238_v25 = vrot.slane %v3237_v24, 1 }
 0xc90   : > { %v3239_v28 = vadd.f32 %v3238_v25, %v3237_v24 }
 0xc92   : > { %4543 = vrcp.f32 %v3239_v28 }
 0xc9b   : > { %v4542_v30 = vpop.eup %4541 }
 0xc9c   : > { %v3242_v31 = vmul.f32 %v4542_v30, %v4538_v12 }
 0xc9e   : > { %3246 = vperm.xlu1 %4527, %v3242_v31  }
 0xc9f   : > { %v4544_v62 = vpop.eup %4543 }
 0xca0   : > { %v3243_v33 = vmul.f32 %v4544_v62, %v4540_v14 }
 0xca2   : > { %3251 = vperm.xlu1 %4527, %v3243_v33  }
 0xd19   : > { %v3247_v37 = vpop.permute.xlu1 %3246 }
 0xd1a   : > { %v3254_v38 = vmul.f32 %v3247_v37, %v5832_v41 }
 0xd1c   : > { %v3256_v39 = vrot.slane %v3254_v38, 4 }
 0xd1d   : > { %v3252_v40 = vpop.permute.xlu1 %3251 }
 0xd1e   : > { %v3257_v42 = vadd.f32 %v3256_v39, %v3254_v38  ;;  %v3255_v43 = vmul.f32 %v3252_v40, %v5835_v27  ;;  %v3390_v27 = vld [vmem:[%s6021_s16] sm:$0x3] }
 0xd1f   : > { %4183 = vmatpush3.xpose.msra.mxu1 %v3390_v27 }
 0xd20   : > { %v3258_v44 = vrot.slane %v3257_v42, 2  ;;  %v3262_v45 = vrot.slane %v3255_v43, 4 }
 0xd22   : > { %v3259_v46 = vadd.f32 %v3258_v44, %v3257_v42  ;;  %v3263_v49 = vadd.f32 %v3262_v45, %v3255_v43 }
 0xd24   : > { %v3260_v50 = vrot.slane %v3259_v46, 1  ;;  %v3264_v52 = vrot.slane %v3263_v49, 2 }
 0xd26   : > { %v3261_v60 = vadd.f32 %v3260_v50, %v3259_v46  ;;  %v3265_v53 = vadd.f32 %v3264_v52, %v3263_v49 }
 0xd28   : > { %v3266_v56 = vrot.slane %v3265_v53, 1  ;;  %v3268_v57 = vpack.c.bf16 %v3261_v60, %v3261_v60 }
 0xd2a   : > { %v3267_v51 = vadd.f32 %v3266_v56, %v3265_v53  ;;  %v3295_v54 = vunpack.c.l.b16 %v3268_v57 }
 0xd2c   : > { %v3269_v55 = vpack.c.bf16 %v3267_v51, %v3267_v51 }
 0xd2e   : > { %v3296_v41 = vunpack.c.l.b16 %v3269_v55 }
 0xd30   : > { %v3298_v4 = vsel %vm3297_vm8, %v3296_v41, %v3295_v54 }
 0xd31   : > { %v3299_v58 = vpack.c.b16 %v3298_v4, %v3298_v4 }
 0xd33   : > { %4179 = vmatmul.mubr.bf16.vlgmr.msra.gmra.mxu0 %v3299_v58 }
 0xdf3   : > { %v3383_v61 = vpop.f32.mrf.mxu0 }
 0xdf4   : > { %v3384_v9 = vadd.f32 %v3915_v59, %v3383_v61 }
 0xdf5   : > { %v4180_v0 = vpop.f32.mrf.mxu0 }
 0xdf6   : > { %v3389_v1 = vmax.f32 %v3384_v9, 0.0 }
 0xdf7   : > { %v3386_v2 = vpop.f32.mrf.mxu0 }
 0xdf8   : > { %4185 = vmatmul.mubr.f32.vlgmr.msra.gmra.mxu1 %v3389_v1 }
 0xdf9   : > { %v4181_v3 = vpop.f32.mrf.mxu0 }
 0xeb8   : > { %v3464_v5 = vpop.f32.mrf.mxu1 }
 0xeb9   : > { %v3465_v47 = vadd.f32 %v3924_v26, %v3464_v5 }
 0xeba   : > { %v4186_v6 = vpop.f32.mrf.mxu1 }
 0xebb   : > { %3469 = vst.msk [vmem:[#allocation21] sm:$0x3] %vm3468_vm9, %v3465_v47 }
 0xebc PF: > { %s6024_s4 = sld [smem:[#allocation30_spill]]  ;;  %s5011_s3 = smov [#allocation21]  }
 0xebd   : > { %s3477_s24 = sshll.u32 %s5011_s3, 4  ;;  %s3478_s24 = int_to_ptr.vmem [resolvable:$true] %s3477_s24 }
 0xebe   : > { %s4899_s27 = scalar_lea.vmem %s3478_s24, 32  ;;  %p4906_p12 = scmp.lt.s32.totalorder %s3478_s24, %s3478_s24 }
 0xebf   : > { %p4900_p5 = scmp.ne.s32.totalorder %s3478_s24, %s4899_s27  ;;  %p4907_p2 = scmp.lt.s32.totalorder %s4899_s27, %s4899_s27 }
 0xec1   : > { %p4908_p13 = por %p4907_p2, %p4906_p12 }
 0xec2   : > { %p4285_p9 = scmp.eq.s32.totalorder %s6024_s4, 3 }
 0xec4   : > { %p4901_p8 = pnand %p4900_p5, %p4285_p9 }
 0xec6   : > { %p4902_p10 = pneg %p4901_p8 }
 0xec8   : > { %p4909_p0 = pnand %p4908_p13, %p4902_p10 }
 0xeca   : > { %4912 = shalt.err (!%p4909_p0)
}
 0xecb   : > { %s6025_s26 = sld [smem:[#allocation51_spill]] }
 0xed1   : > { %4230 = dma.vmem_to_hbm [thread:$0]  (%p4285_p9), %s3478_s24, 32, %s6025_s26, [#allocation6]  }
 0xed2   : > { %4960 = dma.done.wait (%p4285_p9), [#allocation6], 32  }
 0xed3   : > { %4962 = vsyncadd (%p4285_p9), [#allocation6], 4294967264 }
 0xed4 PF: > { %s6026_s1 = sld [smem:[#allocation31_spill]] }
 0xed5   : > { %s6027_s24 = sld [smem:[#allocation28_spill]] }
 0xed6   : > { %s6028_s25 = sld [smem:[#allocation29_spill]] }
 0xed7   : > { %s6029_s5 = sld [smem:[#allocation32_spill]] }
 0xeda   : > { %p36_p1 = scmp.ge.s32.totalorder %s6026_s1, 6  }
 0xedc   :  { %38 = sbr.rel (!%p36_p1) target bundleno = 24 (0x18), region = 265 }
 0xee1   :  { %3490 = vsyncpa [#allocation5], 1 }
 0xee2   :  { %3492 = vsyncpa [#allocation5 + $0x1], 1 }
 0xee3   :  { %3493 = vsyncpa [#allocation8], 1 }
 0xee4   :  { %3494 = vsyncpa [#allocation11], 1 }
 0xee5   :  { %3495 = vsyncpa [#allocation6], 1 }
 0xee6   :  { %3497 = vsyncpa [#allocation6 + $0x1], 1 }

</bundles_post_ra>
